<compile_context>
chip_gen: v7x
topology: tpu7x:2x2x1
jax: 0.10.0
libtpu: 0.0.40
codegen_flags: <defaults>
</compile_context>

<pallas_src>
import jax
import jax.numpy as jnp
from jax.experimental import pallas as pl
from jax.experimental.pallas import tpu as pltpu


# ----------------------------------------------------------------------------
# Kernel 1: cimg_proj — Conv1d(k=1) in native (B, C, L) layout.
#   Per grid step: x_ref (C, tl) bf16, w_ref (O, C) bf16, b_ref (O, 1) f32,
#   o_ref (O, tl) f32.  HBM-bound (AI ~32 flops/byte) -> all wins are layout /
#   DMA-side; K=4096 stays untiled (MXU has huge slack).
# ----------------------------------------------------------------------------
def conv_kernel(x_ref, w_ref, b_ref, o_ref):
    y = jnp.dot(w_ref[...], x_ref[...], preferred_element_type=jnp.float32)
    o_ref[...] = (y + b_ref[...]).astype(o_ref.dtype)


def conv1d_1x1(x, w, b, *, tl_max=1024):
    """x:(B, C, L) f32, w:(O, C), b:(O, 1)  ->  (B, O, L) matching PyTorch Conv1d."""
    B, C, L = x.shape
    O = w.shape[0]

    xb = x.astype(jnp.bfloat16)          # halves HBM read of the K=4096 activation
    wb = w.astype(jnp.bfloat16)
    bb = b.reshape(O, 1).astype(jnp.float32)

    # Column (L) tiling: 128-lane-aligned tiles capped at tl_max (sized for v7x's
    # 64 MiB per-TC VMEM; also near the measured v6e roofline knee).  Tiny L
    # falls back to a single full-extent block (full-dim blocks always satisfy
    # Mosaic tiling rules).  Non-divisible L is zero-padded once wrapper-side
    # and the pad is sliced off after the call — no giant single-block fallback.
    if L >= 256:
        tl = min(tl_max, 128 * pl.cdiv(L, 128))
        n_l = pl.cdiv(L, tl)
        Lp = n_l * tl
        if Lp != L:
            xb = jnp.pad(xb, ((0, 0), (0, 0), (0, Lp - L)))
    else:
        tl, n_l, Lp = L, 1, L

    grid = (B, n_l)

    out = pl.pallas_call(
        conv_kernel,
        out_shape=jax.ShapeDtypeStruct((B, O, Lp), jnp.float32),
        grid=grid,
        in_specs=[
            pl.BlockSpec((None, C, tl), lambda bi, li: (bi, 0, li)),  # streaming x
            pl.BlockSpec((O, C), lambda bi, li: (0, 0)),              # resident weight
            pl.BlockSpec((O, 1), lambda bi, li: (0, 0)),              # resident bias
        ],
        out_specs=pl.BlockSpec((None, O, tl), lambda bi, li: (bi, 0, li)),
        compiler_params=pltpu.CompilerParams(
            # Both grid axes are independent -> megacore sharding on v7x
            # (B * n_l >= 2 in practice gives both TCs work).
            dimension_semantics=("parallel", "parallel"),
            # tl=1024 needs ~17 MiB of double-buffered VMEM: above v5e's 16 MiB
            # scoped default, comfortably under v7x's 64 MiB physical.
            vmem_limit_bytes=40 * 1024 * 1024,
        ),
        cost_estimate=pl.CostEstimate(
            flops=2 * B * Lp * C * O,
            transcendentals=0,
            bytes_accessed=B * C * Lp * 2 + C * O * 2 + B * O * Lp * 4,
        ),
    )(xb, wb, bb)

    if Lp != L:
        out = out[:, :, :L]
    return out


# ----------------------------------------------------------------------------
# Kernel 2: fused heads — txt_proj Linear + bbox_embed MLP(+sigmoid) + erase.
#   One pallas_call, three outputs; operands are tiny and stay resident in
#   VMEM, so fusing amortizes the per-call / per-step overhead.
#   Final MLP layer is pre-padded (at parameter-prep time) to 128 output lanes
#   so the store is unmasked.
# ----------------------------------------------------------------------------
def fused_heads_kernel(txt_ref, wt_ref, bt_ref,
                       tgt_ref, w1_ref, b1_ref, w2_ref, b2_ref, w3_ref, b3_ref,
                       ex_ref, ey_ref,
                       txt_o, coord_o, er_o):
    # txt_proj: (Nt, Cin) @ (Cin, H) + b   (f32 in, f32 MXU accumulation)
    t = jnp.dot(txt_ref[...], wt_ref[...], preferred_element_type=jnp.float32)
    txt_o[...] = (t + bt_ref[...]).astype(txt_o.dtype)

    # bbox_embed: 3-layer MLP + sigmoid (last layer lane-padded to 128)
    h = jnp.dot(tgt_ref[...], w1_ref[...], preferred_element_type=jnp.float32) + b1_ref[...]
    h = jnp.maximum(h, 0.0)
    h = jnp.dot(h, w2_ref[...], preferred_element_type=jnp.float32) + b2_ref[...]
    h = jnp.maximum(h, 0.0)
    z = jnp.dot(h, w3_ref[...], preferred_element_type=jnp.float32) + b3_ref[...]
    coord_o[...] = jax.nn.sigmoid(z).astype(coord_o.dtype)

    # random_erase, eval mode: (x + y) / 2 on a lane-dense flattened layout.
    # TODO(synk): training-mode bernoulli mixing (noise_pos/noise_src) would use
    #             pltpu.prng_seed + pltpu.stateful_bernoulli; eval semantics only.
    er_o[...] = (ex_ref[...] + ey_ref[...]) * 0.5


def _pad_lanes(a, lanes=128):
    """Zero-pad the last dim of a 2-D array up to a multiple of `lanes`."""
    pad = (-a.shape[-1]) % lanes
    if pad == 0:
        return a
    return jnp.pad(a, ((0, 0), (0, pad)))


def fused_heads(txt2d, wt, bt, tgt2d, w1, b1, w2, b2, w3p, b3p, exf, eyf):
    """w3p/b3p are the lane-padded final-layer params (padding hoisted to
    parameter-prep time); exf/eyf are lane-dense flattened erase operands."""
    nt = txt2d.shape[0]
    ng = tgt2d.shape[0]
    hidden = wt.shape[1]

    txt_out, coord_p, er_flat = pl.pallas_call(
        fused_heads_kernel,
        out_shape=(
            jax.ShapeDtypeStruct((nt, hidden), txt2d.dtype),
            jax.ShapeDtypeStruct((ng, w3p.shape[1]), tgt2d.dtype),
            jax.ShapeDtypeStruct(exf.shape, exf.dtype),
        ),
    )(txt2d, wt, bt, tgt2d, w1, b1, w2, b2, w3p, b3p, exf, eyf)
    return txt_out, coord_p, er_flat


# ----------------------------------------------------------------------------
# Deterministic parameter init + pure-JAX reference
# ----------------------------------------------------------------------------
def init_params(key, hidden, clip_ch, bert_ch):
    ks = jax.random.split(key, 10)
    s = 0.02
    return {
        # cimg_proj: Conv1d(4096 -> hidden, k=1)
        "cimg_w": s * jax.random.normal(ks[0], (hidden, clip_ch), jnp.float32),
        "cimg_b": s * jax.random.normal(ks[1], (hidden, 1), jnp.float32),
        # txt_proj: Linear(bert_ch -> hidden)
        "txt_w": s * jax.random.normal(ks[2], (bert_ch, hidden), jnp.float32),
        "txt_b": s * jax.random.normal(ks[3], (1, hidden), jnp.float32),
        # bbox_embed MLP(hidden, hidden, 4, 3)
        "w1": s * jax.random.normal(ks[4], (hidden, hidden), jnp.float32),
        "b1": s * jax.random.normal(ks[5], (1, hidden), jnp.float32),
        "w2": s * jax.random.normal(ks[6], (hidden, hidden), jnp.float32),
        "b2": s * jax.random.normal(ks[7], (1, hidden), jnp.float32),
        "w3": s * jax.random.normal(ks[8], (hidden, 4), jnp.float32),
        "b3": s * jax.random.normal(ks[9], (1, 4), jnp.float32),
    }


def reference(params, clip_src, txt_src, tgt, ex, ey):
    """Pure-JAX reference replicating the PyTorch semantics.
    The conv reference uses the same bf16 operands as the kernel path."""
    w_bf = params["cimg_w"].astype(jnp.bfloat16)
    x_bf = clip_src.astype(jnp.bfloat16)
    clip_out = jnp.einsum("oc,bcl->bol", w_bf, x_bf,
                          preferred_element_type=jnp.float32) + params["cimg_b"][None]
    txt_out = txt_src @ params["txt_w"] + params["txt_b"][0]
    h = jnp.maximum(tgt @ params["w1"] + params["b1"][0], 0.0)
    h = jnp.maximum(h @ params["w2"] + params["b2"][0], 0.0)
    coord = jax.nn.sigmoid(h @ params["w3"] + params["b3"][0])
    er = (ex + ey) / 2.0
    return clip_out, txt_out, coord, er


if __name__ == "__main__":
    hidden = 32          # args.hidden_dim
    clip_ch = 4096       # cimg_proj input channels (from RN50x64)
    bert_ch = 64         # bert.num_channels (small synthetic)
    B = 2                # batch
    HW = 16              # flattened clip spatial tokens (L)
    L_txt = 8            # args.max_query_len
    dec_layers = 2       # decoder depth of hmod/cmod output stack

    key = jax.random.PRNGKey(0)
    kp, k1, k2, k3, k4, k5 = jax.random.split(key, 6)
    params = init_params(kp, hidden, clip_ch, bert_ch)

    clip_src = jax.random.normal(k1, (B, clip_ch, HW), jnp.float32)    # clip(img).flatten(2)
    txt_src = jax.random.normal(k2, (B, L_txt, bert_ch), jnp.float32)  # bert output
    tgt = jax.random.normal(k3, (dec_layers, B, hidden), jnp.float32)  # c_tgt.squeeze(2)
    ex = jax.random.normal(k4, (dec_layers, B, hidden), jnp.float32)   # random_erase x
    ey = jax.random.normal(k5, (dec_layers, B, hidden), jnp.float32)   # random_erase y

    # ---- parameter-prep (hoisted out of the per-step path) ----
    w3p = _pad_lanes(params["w3"])        # (hidden, 128)
    b3p = _pad_lanes(params["b3"])        # (1, 128)
    out_dim = params["w3"].shape[1]       # 4

    # Lane-dense flattening of the erase operands (hoisted reshape).
    er_shape = ex.shape
    total = ex.size
    if total % 128 == 0:
        exf = ex.reshape(total // 128, 128)
        eyf = ey.reshape(total // 128, 128)
    else:
        exf = ex.reshape(-1, er_shape[-1])
        eyf = ey.reshape(-1, er_shape[-1])

    # ---- Pallas path ----
    clip_proj = conv1d_1x1(clip_src, params["cimg_w"], params["cimg_b"])  # (B, hidden, HW)

    txt_proj_out, coord_p, er_flat = fused_heads(
        txt_src.reshape(B * L_txt, bert_ch), params["txt_w"], params["txt_b"],
        tgt.reshape(dec_layers * B, hidden),
        params["w1"], params["b1"], params["w2"], params["b2"],
        w3p, b3p,
        exf, eyf,
    )
    txt_proj_out = txt_proj_out.reshape(B, L_txt, hidden)
    coord = coord_p[:, :out_dim].reshape(dec_layers, B, out_dim)
    pred_boxes = coord[-1]                       # bbox['pred_boxes']
    erased = er_flat.reshape(er_shape)

    jax.block_until_ready((clip_proj, txt_proj_out, coord, pred_boxes, erased))

    # ---- verify against pure JAX reference ----
    r_clip, r_txt, r_coord, r_erase = reference(params, clip_src, txt_src, tgt, ex, ey)
    assert jnp.allclose(clip_proj, r_clip, atol=2e-3, rtol=2e-3)
    assert jnp.allclose(txt_proj_out, r_txt, atol=1e-4, rtol=1e-4)
    assert jnp.allclose(coord, r_coord, atol=1e-5, rtol=1e-5)
    assert jnp.allclose(erased, r_erase, atol=1e-6, rtol=1e-6)

    print("KERNEL_OK")
</pallas_src>

<mosaic_0001>
module attributes {stable_mosaic.version = 11 : i64} {
  func.func @conv_kernel(%arg0: i32, %arg1: i32, %arg2: memref<1x4096x16xbf16, #tpu.memory_space<vmem>>, %arg3: memref<32x4096xbf16, #tpu.memory_space<vmem>>, %arg4: memref<32x1xf32, #tpu.memory_space<vmem>>, %arg5: memref<1x32x16xf32, #tpu.memory_space<vmem>>) attributes {dimension_semantics = [#tpu.dimension_semantics<parallel>, #tpu.dimension_semantics<parallel>], iteration_bounds = array<i64: 2, 1>, scalar_prefetch = 0 : i64, scratch_operands = 0 : i64, tpu.core_type = #tpu.core_type<tc>, window_params = [{transform_indices = @transform_0, window_bounds = array<i64: 1, 4096, 16>}, {pipeline_mode = #tpu.pipeline_mode<synchronous>, transform_indices = @transform_1, window_bounds = array<i64: 32, 4096>}, {pipeline_mode = #tpu.pipeline_mode<synchronous>, transform_indices = @transform_2, window_bounds = array<i64: 32, 1>}, {transform_indices = @transform_3, window_bounds = array<i64: 1, 32, 16>}]} {
    %c0 = arith.constant 0 : index
    %c0_0 = arith.constant 0 : index
    %0 = vector.load %arg3[%c0, %c0_0] : memref<32x4096xbf16, #tpu.memory_space<vmem>>, vector<32x4096xbf16>
    %c0_1 = arith.constant 0 : index
    %c0_2 = arith.constant 0 : index
    %c0_3 = arith.constant 0 : index
    %1 = vector.load %arg2[%c0_1, %c0_2, %c0_3] : memref<1x4096x16xbf16, #tpu.memory_space<vmem>>, vector<1x4096x16xbf16>
    %2 = vector.shape_cast %1 : vector<1x4096x16xbf16> to vector<4096x16xbf16>
    %cst = arith.constant dense<0.000000e+00> : vector<32x16xf32>
    %3 = tpu.matmul %0, %2, %cst {dimension_numbers = #tpu.dot_dimension_numbers<[1], [0], [0], [1], [0, 0, 1, 1], [], []>} : vector<32x4096xbf16>, vector<4096x16xbf16>, vector<32x16xf32> -> vector<32x16xf32>
    %c0_4 = arith.constant 0 : index
    %c0_5 = arith.constant 0 : index
    %4 = vector.load %arg4[%c0_4, %c0_5] : memref<32x1xf32, #tpu.memory_space<vmem>>, vector<32x1xf32>
    %5 = vector.broadcast %4 : vector<32x1xf32> to vector<32x16xf32>
    %6 = arith.addf %3, %5 : vector<32x16xf32>
    %c0_6 = arith.constant 0 : index
    %c0_7 = arith.constant 0 : index
    %c0_8 = arith.constant 0 : index
    %7 = vector.load %arg5[%c0_6, %c0_7, %c0_8] : memref<1x32x16xf32, #tpu.memory_space<vmem>>, vector<1x32x16xf32>
    %8 = vector.shape_cast %7 : vector<1x32x16xf32> to vector<32x16xf32>
    %9 = vector.shape_cast %6 : vector<32x16xf32> to vector<1x32x16xf32>
    tpu.vector_store %arg5[%c0_6, %c0_7, %c0_8], %9 {strides = array<i32>} : memref<1x32x16xf32, #tpu.memory_space<vmem>>, vector<1x32x16xf32>,
    return
  }
  func.func @transform_0(%arg0: i32, %arg1: i32) -> (i32, i32, i32) {
    %c0_i32 = arith.constant 0 : i32
    %c0_i32_0 = arith.constant 0 : i32
    return %arg0, %c0_i32, %arg1 : i32, i32, i32
  }
  func.func @transform_1(%arg0: i32, %arg1: i32) -> (i32, i32) {
    %c0_i32 = arith.constant 0 : i32
    %c0_i32_0 = arith.constant 0 : i32
    %c0_i32_1 = arith.constant 0 : i32
    return %c0_i32, %c0_i32_0 : i32, i32
  }
  func.func @transform_2(%arg0: i32, %arg1: i32) -> (i32, i32) {
    %c0_i32 = arith.constant 0 : i32
    %c0_i32_0 = arith.constant 0 : i32
    %c0_i32_1 = arith.constant 0 : i32
    return %c0_i32, %c0_i32_0 : i32, i32
  }
  func.func @transform_3(%arg0: i32, %arg1: i32) -> (i32, i32, i32) {
    %c0_i32 = arith.constant 0 : i32
    %c0_i32_0 = arith.constant 0 : i32
    return %arg0, %c0_i32, %arg1 : i32, i32, i32
  }
}

</mosaic_0001>

<bundles_post_ra>
// kernel: tpu_custom_call.1
= control target key start
LH: loop header
LB: loop body
LE: loop exit
PB: predicated region body
PF: predicated region fallthrough
CT: control target
= control target key end

     0   :  { %s4640_s12 = smov 0   ;;  %s4642_s13 = smov 0   ;;  %s5189_s0 = inlined_call_operand.vmem [shape: bf16[2,4096,16], index: 0, kind: input, shape index: {}]   ;;  %s5190_s1 = inlined_call_operand.vmem [shape: bf16[32,4096], index: 1, kind: input, shape index: {}]   ;;  %s5191_s2 = inlined_call_operand.vmem [shape: f32[32,1], index: 2, kind: input, shape index: {}]   ;;  %s5192_s3 = inlined_call_operand.vmem [shape: f32[2,32,16], index: 3, kind: output, shape index: {}]  }
   0x1   :  { %s4644_s14 = smov 0  }
   0x2 LB: > { %s25_s15 = sadd.s32 1, %s4613_s13  ;;  %p3535_p0 = scmp.ge.s32.totalorder %s4617_s14, 1  ;;  %s4617_s14 = sphi %s4644_s14, %s13_s14   ;;  %s4613_s13 = sphi %s4642_s13, %s5194_s13   ;;  %s4609_s12 = sphi %s4640_s12, %s5193_s12  }
   0x3   : > { %p27_p1 = scmp.ge.s32.totalorder %s25_s15, 2  ;;  %p156_p2 = scmp.lt.s32.totalorder %s4617_s14, 3 }
   0x5   : > { %s5196_s15 = smov (%p27_p1, %s25_s15), 0  ;;  %p157_p3 = pnand %p3535_p0, %p156_p2 }
   0x6   : > { %p186_p4 = scmp.lt.s32.totalorder (!%p157_p3), %s4609_s12, 1  ;;  %v4661_v0 = vld [vmem:[%s5190_s1] sm:$0xff] (!%p157_p3)  ;;  %v4671_v2 = vld [vmem:[%s5190_s1 + $0x8] sm:$0xff] (!%p157_p3)  ;;  %v4619_v5 = vmov (!%p157_p3), 0   ;;  %v4746_v52 = vld [vmem:[%s5190_s1 + $0x10] sm:$0xff] (!%p157_p3)  ;;  %vm3443_vm0 = vcmask (!%p157_p3), 130048  }
   0x7   : > { %160 = sbr.rel (%p157_p3) target bundleno = 505 (0x1f9), region = 32  ;;  %v4666_v1 = vld [vmem:[%s5190_s1 + $0x80] sm:$0xff] (!%p157_p3)  ;;  %v4678_v4 = vld [vmem:[%s5190_s1 + $0x88] sm:$0xff] (!%p157_p3)  ;;  %4337 = vset.pattern.permute.xlu0 (!%p157_p3), %v4619_v5  ;;  %4338 = vset.pattern.permute.xlu1 (!%p157_p3), %v4619_v5  ;;  %v4751_v53 = vld [vmem:[%s5190_s1 + $0x90] sm:$0xff] (!%p157_p3) }
   0x8   : > { %v3541_v3 = vcombine.high (!%p157_p3), %v4661_v0, %v4666_v1  ;;  %v3543_v6 = vcombine.high (!%p157_p3), %v4671_v2, %v4678_v4  ;;  %v235_v36 = vld [vmem:[%s5190_s1 + $0x100] sm:$0xff] (!%p157_p3)  ;;  %v236_v39 = vld [vmem:[%s5190_s1 + $0x108] sm:$0xff] (!%p157_p3)  ;;  %v3540_v43 = vcombine.low (!%p157_p3), %v4661_v0, %v4666_v1  ;;  %v3542_v44 = vcombine.low (!%p157_p3), %v4671_v2, %v4678_v4  ;;  %v4757_v55 = vld [vmem:[%s5190_s1 + $0x18] sm:$0xff] (!%p157_p3) }
   0x9   : > { %v251_v37 = vld [vmem:[%s5190_s1 + $0x180] sm:$0xff] (!%p157_p3)  ;;  %v252_v40 = vld [vmem:[%s5190_s1 + $0x188] sm:$0xff] (!%p157_p3)  ;;  %v4762_v56 = vld [vmem:[%s5190_s1 + $0x98] sm:$0xff] (!%p157_p3)  ;;  %v3545_v63 = vcombine.high (!%p157_p3), %v4746_v52, %v4751_v53 }
   0xa   : > { %2691 = vmatprep.mubr.bf16.mxu0 (!%p157_p3), %v3541_v3  ;;  %2740 = vmatprep.mubr.bf16.mxu1 (!%p157_p3), %v3543_v6  ;;  %v3573_v47 = vcombine.high (!%p157_p3), %v235_v36, %v251_v37  ;;  %v3575_v49 = vcombine.high (!%p157_p3), %v236_v39, %v252_v40  ;;  %v3572_v59 = vcombine.low (!%p157_p3), %v235_v36, %v251_v37  ;;  %v4818_v36 = vld [vmem:[%s5190_s1 + $0x20] sm:$0xff] (!%p157_p3) }
   0xb   : > { %v3574_v61 = vcombine.low (!%p157_p3), %v236_v39, %v252_v40  ;;  %v3547_v1 = vcombine.high (!%p157_p3), %v4757_v55, %v4762_v56  ;;  %v4823_v37 = vld [vmem:[%s5190_s1 + $0xa0] sm:$0xff] (!%p157_p3) }
   0xe   : > { %s5198_s12 = smov (!%p186_p4, %s4609_s12), 1 }
   0xf   : > { %s3862_s24 = sshll.u32 %s5198_s12, 11  ;;  %s3863_s22 = sshll.u32 %s5198_s12, 5 }
  0x10   : > { %s4688_s27 = scalar_lea.vmem %s5189_s0, %s3862_s24  ;;  %s201_s25 = scalar_lea.vmem %s5192_s3, %s3863_s22 }
  0x11   : > { %v4339_v7 = vld [vmem:[%s4688_s27 + $0x40] sm:$0xff]   ;;  %v4343_v11 = vld [vmem:[%s4688_s27 + $0x48] sm:$0xff]   ;;  %v4347_v15 = vld [vmem:[%s4688_s27 + $0x50] sm:$0xff]  }
  0x12   : > { %v4340_v8 = vld [vmem:[%s4688_s27 + $0xc0] sm:$0xff]   ;;  %3864 = vmatprep.subr.bf16.mxu0 %v4339_v7  ;;  %v4344_v12 = vld [vmem:[%s4688_s27 + $0xc8] sm:$0xff]   ;;  %v4348_v16 = vld [vmem:[%s4688_s27 + $0xd0] sm:$0xff]  }
  0x13   : > { %v4341_v9 = vld [vmem:[%s4688_s27] sm:$0xff]   ;;  %3892 = vmatprep.subr.bf16.mxu1 %v4340_v8  ;;  %v4345_v13 = vld [vmem:[%s4688_s27 + $0x8] sm:$0xff]   ;;  %v4349_v17 = vld [vmem:[%s4688_s27 + $0x10] sm:$0xff]  }
  0x14   : > { %v4342_v10 = vld [vmem:[%s4688_s27 + $0x80] sm:$0xff]   ;;  %3865 = vmatpush3.bf16.msra.mxu0 %v4341_v9  ;;  %v4346_v14 = vld [vmem:[%s4688_s27 + $0x88] sm:$0xff]   ;;  %v4350_v18 = vld [vmem:[%s4688_s27 + $0x90] sm:$0xff]  }
  0x15   : > { %3893 = vmatpush3.bf16.msra.mxu1 %v4342_v10  ;;  %3866 = vmatprep.subr.bf16.mxu0 %v4343_v11  ;;  %v4351_v19 = vld [vmem:[%s4688_s27 + $0x58] sm:$0xff]   ;;  %v4355_v23 = vld [vmem:[%s4688_s27 + $0x60] sm:$0xff]   ;;  %v4359_v27 = vld [vmem:[%s4688_s27 + $0x68] sm:$0xff]  }
  0x16   : > { %3894 = vmatprep.subr.bf16.mxu1 %v4344_v12  ;;  %v4352_v20 = vld [vmem:[%s4688_s27 + $0xd8] sm:$0xff]   ;;  %v4356_v24 = vld [vmem:[%s4688_s27 + $0xe0] sm:$0xff]   ;;  %v4360_v28 = vld [vmem:[%s4688_s27 + $0xe8] sm:$0xff]  }
  0x17   : > { %v4353_v21 = vld [vmem:[%s4688_s27 + $0x18] sm:$0xff]   ;;  %v4357_v25 = vld [vmem:[%s4688_s27 + $0x20] sm:$0xff]   ;;  %v4361_v29 = vld [vmem:[%s4688_s27 + $0x28] sm:$0xff]  }
  0x18   : > { %3867 = vmatpush3.bf16.msra.mxu0 %v4345_v13  ;;  %v4354_v22 = vld [vmem:[%s4688_s27 + $0x98] sm:$0xff]   ;;  %v4358_v26 = vld [vmem:[%s4688_s27 + $0xa0] sm:$0xff]   ;;  %v4362_v30 = vld [vmem:[%s4688_s27 + $0xa8] sm:$0xff]  }
  0x19   : > { %3895 = vmatpush3.bf16.msra.mxu1 %v4346_v14  ;;  %3868 = vmatprep.subr.bf16.mxu0 %v4347_v15  ;;  %v4363_v31 = vld [vmem:[%s4688_s27 + $0x70] sm:$0xff]   ;;  %v4367_v35 = vld [vmem:[%s4688_s27 + $0x78] sm:$0xff]   ;;  %v4371_v45 = vld [vmem:[%s4688_s27 + $0x140] sm:$0xff]  }
  0x1a   : > { %3896 = vmatprep.subr.bf16.mxu1 %v4348_v16  ;;  %v4364_v32 = vld [vmem:[%s4688_s27 + $0xf0] sm:$0xff]   ;;  %v4368_v38 = vld [vmem:[%s4688_s27 + $0xf8] sm:$0xff]   ;;  %v4372_v46 = vld [vmem:[%s4688_s27 + $0x1c0] sm:$0xff]  }
  0x1b   : > { %v4365_v33 = vld [vmem:[%s4688_s27 + $0x30] sm:$0xff]   ;;  %v4369_v41 = vld [vmem:[%s4688_s27 + $0x38] sm:$0xff]   ;;  %v4373_v48 = vld [vmem:[%s4688_s27 + $0x100] sm:$0xff]  }
  0x1c   : > { %3869 = vmatpush3.bf16.msra.mxu0 %v4349_v17  ;;  %v4366_v34 = vld [vmem:[%s4688_s27 + $0xb0] sm:$0xff]   ;;  %v4370_v42 = vld [vmem:[%s4688_s27 + $0xb8] sm:$0xff]   ;;  %v4374_v50 = vld [vmem:[%s4688_s27 + $0x180] sm:$0xff]  }
  0x1d   : > { %3897 = vmatpush3.bf16.msra.mxu1 %v4350_v18  ;;  %3870 = vmatprep.subr.bf16.mxu0 %v4351_v19  ;;  %v4375_v51 = vld [vmem:[%s4688_s27 + $0x148] sm:$0xff]   ;;  %v4379_v60 = vld [vmem:[%s4688_s27 + $0x150] sm:$0xff]   ;;  %v4383_v3 = vld [vmem:[%s4688_s27 + $0x158] sm:$0xff]  }
  0x1e   : > { %3898 = vmatprep.subr.bf16.mxu1 %v4352_v20  ;;  %v4376_v54 = vld [vmem:[%s4688_s27 + $0x1c8] sm:$0xff]   ;;  %v4380_v62 = vld [vmem:[%s4688_s27 + $0x1d0] sm:$0xff]   ;;  %v4384_v4 = vld [vmem:[%s4688_s27 + $0x1d8] sm:$0xff]  }
  0x1f   : > { %v4377_v57 = vld [vmem:[%s4688_s27 + $0x108] sm:$0xff]   ;;  %v4381_v0 = vld [vmem:[%s4688_s27 + $0x110] sm:$0xff]   ;;  %v4385_v5 = vld [vmem:[%s4688_s27 + $0x118] sm:$0xff]  }
  0x20   : > { %3871 = vmatpush3.bf16.msra.mxu0 %v4353_v21  ;;  %v4378_v58 = vld [vmem:[%s4688_s27 + $0x188] sm:$0xff]   ;;  %v4382_v2 = vld [vmem:[%s4688_s27 + $0x190] sm:$0xff]   ;;  %v4386_v6 = vld [vmem:[%s4688_s27 + $0x198] sm:$0xff]  }
  0x21   : > { %3899 = vmatpush3.bf16.msra.mxu1 %v4354_v22  ;;  %3872 = vmatprep.subr.bf16.mxu0 %v4355_v23  ;;  %v4387_v7 = vld [vmem:[%s4688_s27 + $0x160] sm:$0xff]   ;;  %v4391_v11 = vld [vmem:[%s4688_s27 + $0x168] sm:$0xff]   ;;  %v4395_v15 = vld [vmem:[%s4688_s27 + $0x170] sm:$0xff]  }
  0x22   : > { %3900 = vmatprep.subr.bf16.mxu1 %v4356_v24  ;;  %v4388_v8 = vld [vmem:[%s4688_s27 + $0x1e0] sm:$0xff]   ;;  %v4392_v12 = vld [vmem:[%s4688_s27 + $0x1e8] sm:$0xff]   ;;  %v4396_v16 = vld [vmem:[%s4688_s27 + $0x1f0] sm:$0xff]  }
  0x23   : > { %v4389_v9 = vld [vmem:[%s4688_s27 + $0x120] sm:$0xff]   ;;  %v4393_v13 = vld [vmem:[%s4688_s27 + $0x128] sm:$0xff]   ;;  %v4397_v17 = vld [vmem:[%s4688_s27 + $0x130] sm:$0xff]  }
  0x24   : > { %3873 = vmatpush3.bf16.msra.mxu0 %v4357_v25  ;;  %v4390_v10 = vld [vmem:[%s4688_s27 + $0x1a0] sm:$0xff]   ;;  %v4394_v14 = vld [vmem:[%s4688_s27 + $0x1a8] sm:$0xff]   ;;  %v4398_v18 = vld [vmem:[%s4688_s27 + $0x1b0] sm:$0xff]  }
  0x25   : > { %3901 = vmatpush3.bf16.msra.mxu1 %v4358_v26  ;;  %3874 = vmatprep.subr.bf16.mxu0 %v4359_v27  ;;  %v4399_v19 = vld [vmem:[%s4688_s27 + $0x178] sm:$0xff]   ;;  %v237_v20 = vld [vmem:[%s5190_s1 + $0x110] sm:$0xff]  ;;  %v3544_v27 = vcombine.low %v4746_v52, %v4751_v53  ;;  %v4409_v39 = vld [vmem:[%s4688_s27 + $0x208] sm:$0xff]  }
  0x26   : > { %3902 = vmatprep.subr.bf16.mxu1 %v4360_v28  ;;  %v253_v21 = vld [vmem:[%s5190_s1 + $0x190] sm:$0xff]  ;;  %v4400_v22 = vld [vmem:[%s4688_s27 + $0x1f8] sm:$0xff]   ;;  %v3546_v28 = vcombine.low %v4757_v55, %v4762_v56  ;;  %v4410_v40 = vld [vmem:[%s4688_s27 + $0x288] sm:$0xff]  }
  0x27   : > { %v238_v23 = vld [vmem:[%s5190_s1 + $0x118] sm:$0xff]  ;;  %v4419_v52 = vld [vmem:[%s4688_s27 + $0x260] sm:$0xff]   ;;  %v4423_v56 = vld [vmem:[%s4688_s27 + $0x268] sm:$0xff]  }
  0x28   : > { %3875 = vmatpush3.bf16.msra.mxu0 %v4361_v29  ;;  %v254_v24 = vld [vmem:[%s5190_s1 + $0x198] sm:$0xff]  ;;  %v4403_v29 = vld [vmem:[%s4688_s27 + $0x240] sm:$0xff]  }
  0x29   : > { %3903 = vmatpush3.bf16.msra.mxu1 %v4362_v30  ;;  %3876 = vmatprep.subr.bf16.mxu0 %v4363_v31  ;;  %v4401_v25 = vld [vmem:[%s4688_s27 + $0x138] sm:$0xff]   ;;  %v4404_v30 = vld [vmem:[%s4688_s27 + $0x2c0] sm:$0xff]   ;;  %v3577_v31 = vcombine.high %v237_v20, %v253_v21 }
  0x2a   : > { %3904 = vmatprep.subr.bf16.mxu1 %v4364_v32  ;;  %v4402_v26 = vld [vmem:[%s4688_s27 + $0x1b8] sm:$0xff]   ;;  %v4405_v32 = vld [vmem:[%s4688_s27 + $0x200] sm:$0xff]  }
  0x2b   : > { %v4420_v53 = vld [vmem:[%s4688_s27 + $0x2e0] sm:$0xff]  }
  0x2c   : > { %3877 = vmatpush3.bf16.msra.mxu0 %v4365_v33  ;;  %v3579_v33 = vcombine.high %v238_v23, %v254_v24  ;;  %v4422_v55 = vld [vmem:[%s4688_s27 + $0x2a0] sm:$0xff]  }
  0x2d   : > { %3905 = vmatpush3.bf16.msra.mxu1 %v4366_v34  ;;  %3878 = vmatprep.subr.bf16.mxu0 %v4367_v35  ;;  %v4406_v34 = vld [vmem:[%s4688_s27 + $0x280] sm:$0xff]   ;;  %v4407_v35 = vld [vmem:[%s4688_s27 + $0x248] sm:$0xff]  }
  0x2e   : > { %3906 = vmatprep.subr.bf16.mxu1 %v4368_v38  ;;  %v4408_v38 = vld [vmem:[%s4688_s27 + $0x2c8] sm:$0xff]  }
  0x30   : > { %3879 = vmatpush3.bf16.msra.mxu0 %v4369_v41  ;;  %v3576_v41 = vcombine.low %v237_v20, %v253_v21  ;;  %v4443_v21 = vld [vmem:[%s4688_s27 + $0x350] sm:$0xff]  }
  0x31   : > { %3907 = vmatpush3.bf16.msra.mxu1 %v4370_v42  ;;  %3920 = vmatprep.subr.bf16.mxu0 %v4371_v45  ;;  %v4411_v42 = vld [vmem:[%s4688_s27 + $0x250] sm:$0xff]   ;;  %v3549_v45 = vcombine.high %v4818_v36, %v4823_v37 }
  0x32   : > { %3948 = vmatprep.subr.bf16.mxu1 %v4372_v46  ;;  %v4413_v46 = vld [vmem:[%s4688_s27 + $0x210] sm:$0xff]  }
  0x33   : > { %2692 = vmatmul.mubr.bf16.vlgmr.msra.gmra.mrb[0].mxu0 %v3540_v43  ;;  %v3578_v43 = vcombine.low %v238_v23, %v254_v24  ;;  %v240_v23 = vld [vmem:[%s5190_s1 + $0x128] sm:$0xff] }
  0x34   : > { %2741 = vmatmul.mubr.bf16.vlgmr.msra.gmra.mrb[0].mxu1 %v3542_v44  ;;  %3921 = vmatpush3.bf16.msra.mxu0 %v4373_v48  ;;  %v4412_v44 = vld [vmem:[%s4688_s27 + $0x2d0] sm:$0xff]   ;;  %v4415_v48 = vld [vmem:[%s4688_s27 + $0x258] sm:$0xff]   ;;  %v256_v24 = vld [vmem:[%s5190_s1 + $0x1a8] sm:$0xff] }
  0x35   : > { %3949 = vmatpush3.bf16.msra.mxu1 %v4374_v50  ;;  %2699 = vmatprep.mubr.bf16.mxu0 %v3573_v47  ;;  %v4414_v47 = vld [vmem:[%s4688_s27 + $0x290] sm:$0xff]   ;;  %v4417_v50 = vld [vmem:[%s4688_s27 + $0x218] sm:$0xff]  }
  0x36   : > { %3922 = vmatprep.subr.bf16.mxu0 %v4375_v51  ;;  %2748 = vmatprep.mubr.bf16.mxu1 %v3575_v49  ;;  %v4416_v49 = vld [vmem:[%s4688_s27 + $0x2d8] sm:$0xff]  }
  0x37   : > { %3950 = vmatprep.subr.bf16.mxu1 %v4376_v54  ;;  %v4418_v51 = vld [vmem:[%s4688_s27 + $0x298] sm:$0xff]   ;;  %v4421_v54 = vld [vmem:[%s4688_s27 + $0x220] sm:$0xff]  }
  0x38   : > { %3923 = vmatpush3.bf16.msra.mxu0 %v4377_v57  ;;  %v4424_v57 = vld [vmem:[%s4688_s27 + $0x2e8] sm:$0xff]  }
  0x39   : > { %3951 = vmatpush3.bf16.msra.mxu1 %v4378_v58  ;;  %3924 = vmatprep.subr.bf16.mxu0 %v4379_v60  ;;  %v4425_v58 = vld [vmem:[%s4688_s27 + $0x228] sm:$0xff]   ;;  %v4427_v60 = vld [vmem:[%s4688_s27 + $0x270] sm:$0xff]  }
  0x3a   : > { %3952 = vmatprep.subr.bf16.mxu1 %v4380_v62  ;;  %v4429_v62 = vld [vmem:[%s4688_s27 + $0x230] sm:$0xff]  }
  0x3b   : > { %2700 = vmatmul.mubr.bf16.gmra.mrb[4].mxu0 %v3572_v59  ;;  %v4426_v59 = vld [vmem:[%s4688_s27 + $0x2a8] sm:$0xff]  }
  0x3c   : > { %3925 = vmatpush3.bf16.msra.mxu0 %v4381_v0  ;;  %2749 = vmatmul.mubr.bf16.gmra.mrb[4].mxu1 %v3574_v61  ;;  %v4428_v61 = vld [vmem:[%s4688_s27 + $0x2f0] sm:$0xff]   ;;  %v4431_v0 = vld [vmem:[%s4688_s27 + $0x278] sm:$0xff]  }
  0x3d   : > { %3953 = vmatpush3.bf16.msra.mxu1 %v4382_v2  ;;  %2789 = vmatprep.mubr.bf16.mxu0 %v3545_v63  ;;  %v4430_v63 = vld [vmem:[%s4688_s27 + $0x2b0] sm:$0xff]   ;;  %v4433_v2 = vld [vmem:[%s4688_s27 + $0x238] sm:$0xff]  }
  0x3e   : > { %3926 = vmatprep.subr.bf16.mxu0 %v4383_v3  ;;  %2838 = vmatprep.mubr.bf16.mxu1 %v3547_v1  ;;  %v4432_v1 = vld [vmem:[%s4688_s27 + $0x2f8] sm:$0xff]  }
  0x3f   : > { %3954 = vmatprep.subr.bf16.mxu1 %v4384_v4  ;;  %v4434_v3 = vld [vmem:[%s4688_s27 + $0x2b8] sm:$0xff]   ;;  %v3548_v4 = vcombine.low %v4818_v36, %v4823_v37  ;;  %v4454_v36 = vld [vmem:[%s4688_s27 + $0x3a0] sm:$0xff]   ;;  %v4455_v37 = vld [vmem:[%s4688_s27 + $0x368] sm:$0xff]  }
  0x40   : > { %3927 = vmatpush3.bf16.msra.mxu0 %v4385_v5  ;;  %v208_v5 = vld [vmem:[%s5190_s1 + $0x28] sm:$0xff] }
  0x41   : > { %3955 = vmatpush3.bf16.msra.mxu1 %v4386_v6  ;;  %3928 = vmatprep.subr.bf16.mxu0 %v4387_v7  ;;  %v224_v6 = vld [vmem:[%s5190_s1 + $0xa8] sm:$0xff] }
  0x42   : > { %3956 = vmatprep.subr.bf16.mxu1 %v4388_v8  ;;  %v3550_v7 = vcombine.low %v208_v5, %v224_v6  ;;  %v3551_v8 = vcombine.high %v208_v5, %v224_v6 }
  0x44   : > { %3929 = vmatpush3.bf16.msra.mxu0 %v4389_v9  ;;  %v4435_v9 = vld [vmem:[%s4688_s27 + $0x340] sm:$0xff]  }
  0x45   : > { %3957 = vmatpush3.bf16.msra.mxu1 %v4390_v10  ;;  %3930 = vmatprep.subr.bf16.mxu0 %v4391_v11  ;;  %v4436_v10 = vld [vmem:[%s4688_s27 + $0x3c0] sm:$0xff]  }
  0x46   : > { %3958 = vmatprep.subr.bf16.mxu1 %v4392_v12  ;;  %v4437_v11 = vld [vmem:[%s4688_s27 + $0x300] sm:$0xff]  }
  0x47   : > { %v4438_v12 = vld [vmem:[%s4688_s27 + $0x380] sm:$0xff]  }
  0x48   : > { %3931 = vmatpush3.bf16.msra.mxu0 %v4393_v13  ;;  %v4439_v13 = vld [vmem:[%s4688_s27 + $0x348] sm:$0xff]  }
  0x49   : > { %3959 = vmatpush3.bf16.msra.mxu1 %v4394_v14  ;;  %3932 = vmatprep.subr.bf16.mxu0 %v4395_v15  ;;  %v4440_v14 = vld [vmem:[%s4688_s27 + $0x3c8] sm:$0xff]  }
  0x4a   : > { %3960 = vmatprep.subr.bf16.mxu1 %v4396_v16  ;;  %v4441_v15 = vld [vmem:[%s4688_s27 + $0x308] sm:$0xff]  }
  0x4b   : > { %v4442_v16 = vld [vmem:[%s4688_s27 + $0x388] sm:$0xff]  }
  0x4c   : > { %3933 = vmatpush3.bf16.msra.mxu0 %v4397_v17  ;;  %v239_v17 = vld [vmem:[%s5190_s1 + $0x120] sm:$0xff] }
  0x4d   : > { %3961 = vmatpush3.bf16.msra.mxu1 %v4398_v18  ;;  %3934 = vmatprep.subr.bf16.mxu0 %v4399_v19  ;;  %v255_v18 = vld [vmem:[%s5190_s1 + $0x1a0] sm:$0xff] }
  0x4e   : > { %3962 = vmatprep.subr.bf16.mxu1 %v4400_v22  ;;  %v3581_v19 = vcombine.high %v239_v17, %v255_v18  ;;  %v3580_v20 = vcombine.low %v239_v17, %v255_v18  ;;  %v4444_v22 = vld [vmem:[%s4688_s27 + $0x3d0] sm:$0xff]   ;;  %v4480_v17 = vld [vmem:[%s4688_s27 + $0x4d8] sm:$0xff]  }
  0x4f   : > { %v4481_v18 = vld [vmem:[%s4688_s27 + $0x418] sm:$0xff]  }
  0x50   : > { %3935 = vmatpush3.bf16.msra.mxu0 %v4401_v25  ;;  %v3583_v25 = vcombine.high %v240_v23, %v256_v24 }
  0x51   : > { %3963 = vmatpush3.bf16.msra.mxu1 %v4402_v26  ;;  %3976 = vmatprep.subr.bf16.mxu0 %v4403_v29  ;;  %v4445_v26 = vld [vmem:[%s4688_s27 + $0x310] sm:$0xff]   ;;  %v4447_v29 = vld [vmem:[%s4688_s27 + $0x358] sm:$0xff]  }
  0x52   : > { %4004 = vmatprep.subr.bf16.mxu1 %v4404_v30  ;;  %v4448_v30 = vld [vmem:[%s4688_s27 + $0x3d8] sm:$0xff]  }
  0x53   : > { %2790 = vmatmul.mubr.bf16.vlgmr.msra.gmra.mrb[8].mxu0 %v3544_v27  ;;  %v3582_v27 = vcombine.low %v240_v23, %v256_v24  ;;  %v4485_v23 = vld [vmem:[%s4688_s27 + $0x420] sm:$0xff]  }
  0x54   : > { %2839 = vmatmul.mubr.bf16.vlgmr.msra.gmra.mrb[8].mxu1 %v3546_v28  ;;  %3977 = vmatpush3.bf16.msra.mxu0 %v4405_v32  ;;  %v4446_v28 = vld [vmem:[%s4688_s27 + $0x390] sm:$0xff]   ;;  %v4450_v32 = vld [vmem:[%s4688_s27 + $0x398] sm:$0xff]   ;;  %v4486_v24 = vld [vmem:[%s4688_s27 + $0x4a0] sm:$0xff]  }
  0x55   : > { %4005 = vmatpush3.bf16.msra.mxu1 %v4406_v34  ;;  %2797 = vmatprep.mubr.bf16.mxu0 %v3577_v31  ;;  %v4449_v31 = vld [vmem:[%s4688_s27 + $0x318] sm:$0xff]   ;;  %v4452_v34 = vld [vmem:[%s4688_s27 + $0x3e0] sm:$0xff]  }
  0x56   : > { %3978 = vmatprep.subr.bf16.mxu0 %v4407_v35  ;;  %2846 = vmatprep.mubr.bf16.mxu1 %v3579_v33  ;;  %v4451_v33 = vld [vmem:[%s4688_s27 + $0x360] sm:$0xff]  }
  0x57   : > { %4006 = vmatprep.subr.bf16.mxu1 %v4408_v38  ;;  %v4453_v35 = vld [vmem:[%s4688_s27 + $0x320] sm:$0xff]   ;;  %v4456_v38 = vld [vmem:[%s4688_s27 + $0x3e8] sm:$0xff]  }
  0x58   : > { %3979 = vmatpush3.bf16.msra.mxu0 %v4409_v39  ;;  %v779_v39 = vld [vmem:[%s5191_s2] sm:$0xff] }
  0x59   : > { %4007 = vmatpush3.bf16.msra.mxu1 %v4410_v40  ;;  %3980 = vmatprep.subr.bf16.mxu0 %v4411_v42  ;;  %v4457_v40 = vld [vmem:[%s4688_s27 + $0x328] sm:$0xff]   ;;  %v4459_v42 = vld [vmem:[%s4688_s27 + $0x370] sm:$0xff]  }
  0x5a   : > { %4008 = vmatprep.subr.bf16.mxu1 %v4412_v44  ;;  %785 = vperm.xlu0 %4337, %v779_v39   ;;  %v780_v44 = vld [vmem:[%s5191_s2 + $0x8] sm:$0xff] }
  0x5b   : > { %2798 = vmatmul.mubr.bf16.gmra.mrb[12].mxu0 %v3576_v41  ;;  %v4458_v41 = vld [vmem:[%s4688_s27 + $0x3a8] sm:$0xff]  }
  0x5c   : > { %3981 = vmatpush3.bf16.msra.mxu0 %v4413_v46  ;;  %2847 = vmatmul.mubr.bf16.gmra.mrb[12].mxu1 %v3578_v43  ;;  %v4460_v43 = vld [vmem:[%s4688_s27 + $0x3f0] sm:$0xff]   ;;  %v212_v39 = vld [vmem:[%s5190_s1 + $0x48] sm:$0xff] }
  0x5d   : > { %4009 = vmatpush3.bf16.msra.mxu1 %v4414_v47  ;;  %2887 = vmatprep.mubr.bf16.mxu0 %v3549_v45  ;;  %v4461_v45 = vld [vmem:[%s4688_s27 + $0x330] sm:$0xff]   ;;  %v4463_v47 = vld [vmem:[%s4688_s27 + $0x378] sm:$0xff]  }
  0x5e   : > { %3982 = vmatprep.subr.bf16.mxu0 %v4415_v48  ;;  %4010 = vmatprep.subr.bf16.mxu1 %v4416_v49  ;;  %v4462_v46 = vld [vmem:[%s4688_s27 + $0x3b0] sm:$0xff]   ;;  %v4464_v48 = vld [vmem:[%s4688_s27 + $0x3f8] sm:$0xff]  }
  0x5f   : > { %2936 = vmatprep.mubr.bf16.mxu1 %v3551_v8  ;;  %790 = vperm.xlu0 %4337, %v780_v44   ;;  %v4465_v49 = vld [vmem:[%s4688_s27 + $0x338] sm:$0xff]   ;;  %v4476_v8 = vld [vmem:[%s4688_s27 + $0x4d0] sm:$0xff]  }
  0x60   : > { %3983 = vmatpush3.bf16.msra.mxu0 %v4417_v50  ;;  %v4466_v50 = vld [vmem:[%s4688_s27 + $0x3b8] sm:$0xff]  }
  0x61   : > { %4011 = vmatpush3.bf16.msra.mxu1 %v4418_v51  ;;  %3984 = vmatprep.subr.bf16.mxu0 %v4419_v52  ;;  %v209_v51 = vld [vmem:[%s5190_s1 + $0x30] sm:$0xff] }
  0x62   : > { %4012 = vmatprep.subr.bf16.mxu1 %v4420_v53  ;;  %v225_v52 = vld [vmem:[%s5190_s1 + $0xb0] sm:$0xff]  ;;  %v210_v53 = vld [vmem:[%s5190_s1 + $0x38] sm:$0xff] }
  0x64   : > { %3985 = vmatpush3.bf16.msra.mxu0 %v4421_v54  ;;  %v226_v54 = vld [vmem:[%s5190_s1 + $0xb8] sm:$0xff] }
  0x65   : > { %4013 = vmatpush3.bf16.msra.mxu1 %v4422_v55  ;;  %3986 = vmatprep.subr.bf16.mxu0 %v4423_v56  ;;  %v3552_v55 = vcombine.low %v209_v51, %v225_v52  ;;  %v3553_v56 = vcombine.high %v209_v51, %v225_v52  ;;  %v4505_v51 = vld [vmem:[%s4688_s27 + $0x508] sm:$0xff]  }
  0x66   : > { %4014 = vmatprep.subr.bf16.mxu1 %v4424_v57  ;;  %v3554_v57 = vcombine.low %v210_v53, %v226_v54  ;;  %v4506_v52 = vld [vmem:[%s4688_s27 + $0x588] sm:$0xff]  }
  0x68   : > { %3987 = vmatpush3.bf16.msra.mxu0 %v4425_v58  ;;  %v3555_v58 = vcombine.high %v210_v53, %v226_v54  ;;  %v243_v53 = vld [vmem:[%s5190_s1 + $0x140] sm:$0xff] }
  0x69   : > { %4015 = vmatpush3.bf16.msra.mxu1 %v4426_v59  ;;  %3988 = vmatprep.subr.bf16.mxu0 %v4427_v60  ;;  %v4467_v59 = vld [vmem:[%s4688_s27 + $0x440] sm:$0xff]  }
  0x6a   : > { %4016 = vmatprep.subr.bf16.mxu1 %v4428_v61  ;;  %v4468_v60 = vld [vmem:[%s4688_s27 + $0x4c0] sm:$0xff]  }
  0x6b   : > { %v4469_v61 = vld [vmem:[%s4688_s27 + $0x400] sm:$0xff]  }
  0x6c   : > { %3989 = vmatpush3.bf16.msra.mxu0 %v4429_v62  ;;  %v4470_v62 = vld [vmem:[%s4688_s27 + $0x480] sm:$0xff]  }
  0x6d   : > { %4017 = vmatpush3.bf16.msra.mxu1 %v4430_v63  ;;  %3990 = vmatprep.subr.bf16.mxu0 %v4431_v0  ;;  %v4471_v63 = vld [vmem:[%s4688_s27 + $0x448] sm:$0xff]   ;;  %v259_v54 = vld [vmem:[%s5190_s1 + $0x1c0] sm:$0xff] }
  0x6e   : > { %4018 = vmatprep.subr.bf16.mxu1 %v4432_v1  ;;  %v4472_v0 = vld [vmem:[%s4688_s27 + $0x4c8] sm:$0xff]  }
  0x6f   : > { %v4473_v1 = vld [vmem:[%s4688_s27 + $0x408] sm:$0xff]  }
  0x70   : > { %3991 = vmatpush3.bf16.msra.mxu0 %v4433_v2  ;;  %v4474_v2 = vld [vmem:[%s4688_s27 + $0x488] sm:$0xff]  }
  0x71   : > { %4019 = vmatpush3.bf16.msra.mxu1 %v4434_v3  ;;  %4032 = vmatprep.subr.bf16.mxu0 %v4435_v9  ;;  %v241_v3 = vld [vmem:[%s5190_s1 + $0x130] sm:$0xff]  ;;  %v242_v9 = vld [vmem:[%s5190_s1 + $0x138] sm:$0xff] }
  0x72   : > { %4060 = vmatprep.subr.bf16.mxu1 %v4436_v10  ;;  %v258_v10 = vld [vmem:[%s5190_s1 + $0x1b8] sm:$0xff] }
  0x73   : > { %2888 = vmatmul.mubr.bf16.vlgmr.msra.gmra.mrb[16].mxu0 %v3548_v4  ;;  %v257_v4 = vld [vmem:[%s5190_s1 + $0x1b0] sm:$0xff] }
  0x74   : > { %2937 = vmatmul.mubr.bf16.vlgmr.msra.gmra.mrb[16].mxu1 %v3550_v7  ;;  %4033 = vmatpush3.bf16.msra.mxu0 %v4437_v11  ;;  %v3585_v5 = vcombine.high %v241_v3, %v257_v4  ;;  %v3584_v6 = vcombine.low %v241_v3, %v257_v4  ;;  %v4475_v7 = vld [vmem:[%s4688_s27 + $0x450] sm:$0xff]   ;;  %v3587_v11 = vcombine.high %v242_v9, %v258_v10  ;;  %v4513_v3 = vld [vmem:[%s4688_s27 + $0x518] sm:$0xff]  }
  0x75   : > { %4061 = vmatpush3.bf16.msra.mxu1 %v4438_v12  ;;  %4034 = vmatprep.subr.bf16.mxu0 %v4439_v13  ;;  %v4477_v12 = vld [vmem:[%s4688_s27 + $0x410] sm:$0xff]   ;;  %v3586_v13 = vcombine.low %v242_v9, %v258_v10  ;;  %v4514_v4 = vld [vmem:[%s4688_s27 + $0x598] sm:$0xff]   ;;  %v4519_v9 = vld [vmem:[%s4688_s27 + $0x568] sm:$0xff]  }
  0x76   : > { %4062 = vmatprep.subr.bf16.mxu1 %v4440_v14  ;;  %2895 = vmatprep.mubr.bf16.mxu0 %v3581_v19  ;;  %v4478_v14 = vld [vmem:[%s4688_s27 + $0x490] sm:$0xff]   ;;  %v4482_v19 = vld [vmem:[%s4688_s27 + $0x498] sm:$0xff]   ;;  %v4520_v10 = vld [vmem:[%s4688_s27 + $0x5e8] sm:$0xff]  }
  0x77   : > { %2944 = vmatprep.mubr.bf16.mxu1 %v3583_v25  ;;  %v4487_v25 = vld [vmem:[%s4688_s27 + $0x468] sm:$0xff]  }
  0x78   : > { %4035 = vmatpush3.bf16.msra.mxu0 %v4441_v15  ;;  %v781_v15 = vld [vmem:[%s5191_s2 + $0x10] sm:$0xff] }
  0x79   : > { %4063 = vmatpush3.bf16.msra.mxu1 %v4442_v16  ;;  %4036 = vmatprep.subr.bf16.mxu0 %v4443_v21  ;;  %v4479_v16 = vld [vmem:[%s4688_s27 + $0x458] sm:$0xff]   ;;  %v4483_v21 = vld [vmem:[%s4688_s27 + $0x460] sm:$0xff]  }
  0x7a   : > { %4064 = vmatprep.subr.bf16.mxu1 %v4444_v22  ;;  %795 = vperm.xlu1 %4338, %v781_v15   ;;  %v4484_v22 = vld [vmem:[%s4688_s27 + $0x4e0] sm:$0xff]   ;;  %v4525_v15 = vld [vmem:[%s4688_s27 + $0x530] sm:$0xff]  }
  0x7b   : > { %2896 = vmatmul.mubr.bf16.gmra.mrb[20].mxu0 %v3580_v20  ;;  %v782_v20 = vld [vmem:[%s5191_s2 + $0x18] sm:$0xff] }
  0x7c   : > { %4037 = vmatpush3.bf16.msra.mxu0 %v4445_v26  ;;  %2945 = vmatmul.mubr.bf16.gmra.mrb[20].mxu1 %v3582_v27  ;;  %v4488_v26 = vld [vmem:[%s4688_s27 + $0x4e8] sm:$0xff]  }
  0x7d   : > { %4065 = vmatpush3.bf16.msra.mxu1 %v4446_v28  ;;  %4038 = vmatprep.subr.bf16.mxu0 %v4447_v29  ;;  %v4489_v27 = vld [vmem:[%s4688_s27 + $0x428] sm:$0xff]   ;;  %v4491_v29 = vld [vmem:[%s4688_s27 + $0x470] sm:$0xff]  }
  0x7e   : > { %4066 = vmatprep.subr.bf16.mxu1 %v4448_v30  ;;  %2985 = vmatprep.mubr.bf16.mxu0 %v3553_v56  ;;  %v4490_v28 = vld [vmem:[%s4688_s27 + $0x4a8] sm:$0xff]   ;;  %v4492_v30 = vld [vmem:[%s4688_s27 + $0x4f0] sm:$0xff]   ;;  %v3588_v56 = vcombine.low %v243_v53, %v259_v54 }
  0x7f   : > { %3034 = vmatprep.mubr.bf16.mxu1 %v3555_v58  ;;  %800 = vperm.xlu1 %4338, %v782_v20   ;;  %v4508_v58 = vld [vmem:[%s4688_s27 + $0x5d0] sm:$0xff]   ;;  %v4530_v20 = vld [vmem:[%s4688_s27 + $0x5b8] sm:$0xff]  }
  0x80   : > { %4039 = vmatpush3.bf16.msra.mxu0 %v4449_v31  ;;  %v4493_v31 = vld [vmem:[%s4688_s27 + $0x430] sm:$0xff]  }
  0x81   : > { %4067 = vmatpush3.bf16.msra.mxu1 %v4450_v32  ;;  %4040 = vmatprep.subr.bf16.mxu0 %v4451_v33  ;;  %v4494_v32 = vld [vmem:[%s4688_s27 + $0x4b0] sm:$0xff]   ;;  %v4495_v33 = vld [vmem:[%s4688_s27 + $0x478] sm:$0xff]  }
  0x82   : > { %4068 = vmatprep.subr.bf16.mxu1 %v4452_v34  ;;  %v4496_v34 = vld [vmem:[%s4688_s27 + $0x4f8] sm:$0xff]  }
  0x84   : > { %4041 = vmatpush3.bf16.msra.mxu0 %v4453_v35  ;;  %v4497_v35 = vld [vmem:[%s4688_s27 + $0x438] sm:$0xff]  }
  0x85   : > { %4069 = vmatpush3.bf16.msra.mxu1 %v4454_v36  ;;  %4042 = vmatprep.subr.bf16.mxu0 %v4455_v37  ;;  %v4498_v36 = vld [vmem:[%s4688_s27 + $0x4b8] sm:$0xff]   ;;  %v211_v37 = vld [vmem:[%s5190_s1 + $0x40] sm:$0xff] }
  0x86   : > { %4070 = vmatprep.subr.bf16.mxu1 %v4456_v38  ;;  %v227_v38 = vld [vmem:[%s5190_s1 + $0xc0] sm:$0xff] }
  0x88   : > { %4043 = vmatpush3.bf16.msra.mxu0 %v4457_v40  ;;  %v3556_v40 = vcombine.low %v211_v37, %v227_v38 }
  0x89   : > { %4071 = vmatpush3.bf16.msra.mxu1 %v4458_v41  ;;  %4044 = vmatprep.subr.bf16.mxu0 %v4459_v42  ;;  %v3557_v41 = vcombine.high %v211_v37, %v227_v38  ;;  %v228_v42 = vld [vmem:[%s5190_s1 + $0xc8] sm:$0xff]  ;;  %v245_v37 = vld [vmem:[%s5190_s1 + $0x150] sm:$0xff] }
  0x8a   : > { %4072 = vmatprep.subr.bf16.mxu1 %v4460_v43  ;;  %v3558_v43 = vcombine.low %v212_v39, %v228_v42  ;;  %v3559_v44 = vcombine.high %v212_v39, %v228_v42  ;;  %v261_v38 = vld [vmem:[%s5190_s1 + $0x1d0] sm:$0xff] }
  0x8b   : > { %v3593_v39 = vcombine.high %v245_v37, %v261_v38  ;;  %v4540_v42 = vld [vmem:[%s4688_s27 + $0x6d0] sm:$0xff]  }
  0x8c   : > { %4045 = vmatpush3.bf16.msra.mxu0 %v4461_v45  ;;  %v4499_v45 = vld [vmem:[%s4688_s27 + $0x540] sm:$0xff]  }
  0x8d   : > { %4073 = vmatpush3.bf16.msra.mxu1 %v4462_v46  ;;  %4046 = vmatprep.subr.bf16.mxu0 %v4463_v47  ;;  %v4500_v46 = vld [vmem:[%s4688_s27 + $0x5c0] sm:$0xff]  }
  0x8e   : > { %4074 = vmatprep.subr.bf16.mxu1 %v4464_v48  ;;  %v4501_v47 = vld [vmem:[%s4688_s27 + $0x500] sm:$0xff]  }
  0x8f   : > { %v4502_v48 = vld [vmem:[%s4688_s27 + $0x580] sm:$0xff]  }
  0x90   : > { %4047 = vmatpush3.bf16.msra.mxu0 %v4465_v49  ;;  %v4503_v49 = vld [vmem:[%s4688_s27 + $0x548] sm:$0xff]  }
  0x91   : > { %4075 = vmatpush3.bf16.msra.mxu1 %v4466_v50  ;;  %4088 = vmatprep.subr.bf16.mxu0 %v4467_v59  ;;  %v4504_v50 = vld [vmem:[%s4688_s27 + $0x5c8] sm:$0xff]  }
  0x92   : > { %4116 = vmatprep.subr.bf16.mxu1 %v4468_v60  ;;  %v244_v59 = vld [vmem:[%s5190_s1 + $0x148] sm:$0xff] }
  0x93   : > { %2986 = vmatmul.mubr.bf16.vlgmr.msra.gmra.mrb[24].mxu0 %v3552_v55  ;;  %v3589_v55 = vcombine.high %v243_v53, %v259_v54  ;;  %v260_v60 = vld [vmem:[%s5190_s1 + $0x1c8] sm:$0xff]  ;;  %v4547_v53 = vld [vmem:[%s4688_s27 + $0x660] sm:$0xff]  }
  0x94   : > { %3035 = vmatmul.mubr.bf16.vlgmr.msra.gmra.mrb[24].mxu1 %v3554_v57  ;;  %4089 = vmatpush3.bf16.msra.mxu0 %v4469_v61  ;;  %v4507_v57 = vld [vmem:[%s4688_s27 + $0x550] sm:$0xff]   ;;  %v3591_v61 = vcombine.high %v244_v59, %v260_v60  ;;  %v4548_v54 = vld [vmem:[%s4688_s27 + $0x6e0] sm:$0xff]  }
  0x95   : > { %4117 = vmatpush3.bf16.msra.mxu1 %v4470_v62  ;;  %4090 = vmatprep.subr.bf16.mxu0 %v4471_v63  ;;  %v4509_v62 = vld [vmem:[%s4688_s27 + $0x510] sm:$0xff]   ;;  %v3590_v63 = vcombine.low %v244_v59, %v260_v60  ;;  %v4553_v59 = vld [vmem:[%s4688_s27 + $0x628] sm:$0xff]  }
  0x96   : > { %4118 = vmatprep.subr.bf16.mxu1 %v4472_v0  ;;  %2993 = vmatprep.mubr.bf16.mxu0 %v3585_v5  ;;  %v4510_v0 = vld [vmem:[%s4688_s27 + $0x590] sm:$0xff]   ;;  %v4515_v5 = vld [vmem:[%s4688_s27 + $0x560] sm:$0xff]   ;;  %v4554_v60 = vld [vmem:[%s4688_s27 + $0x6a8] sm:$0xff]  }
  0x97   : > { %3042 = vmatprep.mubr.bf16.mxu1 %v3587_v11  ;;  %v4521_v11 = vld [vmem:[%s4688_s27 + $0x528] sm:$0xff]  }
  0x98   : > { %4091 = vmatpush3.bf16.msra.mxu0 %v4473_v1  ;;  %v4511_v1 = vld [vmem:[%s4688_s27 + $0x558] sm:$0xff]  }
  0x99   : > { %4119 = vmatpush3.bf16.msra.mxu1 %v4474_v2  ;;  %4092 = vmatprep.subr.bf16.mxu0 %v4475_v7  ;;  %v4512_v2 = vld [vmem:[%s4688_s27 + $0x5d8] sm:$0xff]   ;;  %v4517_v7 = vld [vmem:[%s4688_s27 + $0x520] sm:$0xff]  }
  0x9a   : > { %4120 = vmatprep.subr.bf16.mxu1 %v4476_v8  ;;  %v4518_v8 = vld [vmem:[%s4688_s27 + $0x5a0] sm:$0xff]  }
  0x9b   : > { %2994 = vmatmul.mubr.bf16.gmra.mrb[28].mxu0 %v3584_v6  ;;  %v4516_v6 = vld [vmem:[%s4688_s27 + $0x5e0] sm:$0xff]  }
  0x9c   : > { %4093 = vmatpush3.bf16.msra.mxu0 %v4477_v12  ;;  %3043 = vmatmul.mubr.bf16.gmra.mrb[28].mxu1 %v3586_v13  ;;  %v4522_v12 = vld [vmem:[%s4688_s27 + $0x5a8] sm:$0xff]   ;;  %v4523_v13 = vld [vmem:[%s4688_s27 + $0x570] sm:$0xff]  }
  0x9d   : > { %4121 = vmatpush3.bf16.msra.mxu1 %v4478_v14  ;;  %4094 = vmatprep.subr.bf16.mxu0 %v4479_v16  ;;  %v4524_v14 = vld [vmem:[%s4688_s27 + $0x5f0] sm:$0xff]  }
  0x9e   : > { %4122 = vmatprep.subr.bf16.mxu1 %v4480_v17  ;;  %3083 = vmatprep.mubr.bf16.mxu0 %v3557_v41  ;;  %v4526_v16 = vld [vmem:[%s4688_s27 + $0x5b0] sm:$0xff]   ;;  %v4527_v17 = vld [vmem:[%s4688_s27 + $0x578] sm:$0xff]  }
  0x9f   : > { %3132 = vmatprep.mubr.bf16.mxu1 %v3559_v44  ;;  %v4539_v41 = vld [vmem:[%s4688_s27 + $0x650] sm:$0xff]   ;;  %v262_v44 = vld [vmem:[%s5190_s1 + $0x1d8] sm:$0xff] }
  0xa0   : > { %4095 = vmatpush3.bf16.msra.mxu0 %v4481_v18  ;;  %v4528_v18 = vld [vmem:[%s4688_s27 + $0x5f8] sm:$0xff]  }
  0xa1   : > { %4123 = vmatpush3.bf16.msra.mxu1 %v4482_v19  ;;  %4096 = vmatprep.subr.bf16.mxu0 %v4483_v21  ;;  %v4529_v19 = vld [vmem:[%s4688_s27 + $0x538] sm:$0xff]   ;;  %v213_v21 = vld [vmem:[%s5190_s1 + $0x50] sm:$0xff] }
  0xa2   : > { %4124 = vmatprep.subr.bf16.mxu1 %v4484_v22  ;;  %v229_v22 = vld [vmem:[%s5190_s1 + $0xd0] sm:$0xff] }
  0xa4   : > { %4097 = vmatpush3.bf16.msra.mxu0 %v4485_v23  ;;  %v214_v23 = vld [vmem:[%s5190_s1 + $0x58] sm:$0xff] }
  0xa5   : > { %4125 = vmatpush3.bf16.msra.mxu1 %v4486_v24  ;;  %4098 = vmatprep.subr.bf16.mxu0 %v4487_v25  ;;  %v230_v24 = vld [vmem:[%s5190_s1 + $0xd8] sm:$0xff]  ;;  %v3560_v25 = vcombine.low %v213_v21, %v229_v22 }
  0xa6   : > { %4126 = vmatprep.subr.bf16.mxu1 %v4488_v26  ;;  %v3561_v26 = vcombine.high %v213_v21, %v229_v22  ;;  %v247_v21 = vld [vmem:[%s5190_s1 + $0x160] sm:$0xff] }
  0xa7   : > { %v263_v22 = vld [vmem:[%s5190_s1 + $0x1e0] sm:$0xff] }
  0xa8   : > { %4099 = vmatpush3.bf16.msra.mxu0 %v4489_v27  ;;  %v3562_v27 = vcombine.low %v214_v23, %v230_v24 }
  0xa9   : > { %4127 = vmatpush3.bf16.msra.mxu1 %v4490_v28  ;;  %4100 = vmatprep.subr.bf16.mxu0 %v4491_v29  ;;  %v3563_v28 = vcombine.high %v214_v23, %v230_v24  ;;  %v4531_v29 = vld [vmem:[%s4688_s27 + $0x640] sm:$0xff]   ;;  %v3597_v23 = vcombine.high %v247_v21, %v263_v22  ;;  %v3596_v24 = vcombine.low %v247_v21, %v263_v22  ;;  %v218_v21 = vld [vmem:[%s5190_s1 + $0x78] sm:$0xff] }
  0xaa   : > { %4128 = vmatprep.subr.bf16.mxu1 %v4492_v30  ;;  %v4532_v30 = vld [vmem:[%s4688_s27 + $0x6c0] sm:$0xff]  }
  0xac   : > { %4101 = vmatpush3.bf16.msra.mxu0 %v4493_v31  ;;  %v4533_v31 = vld [vmem:[%s4688_s27 + $0x600] sm:$0xff]  }
  0xad   : > { %4129 = vmatpush3.bf16.msra.mxu1 %v4494_v32  ;;  %4102 = vmatprep.subr.bf16.mxu0 %v4495_v33  ;;  %v4534_v32 = vld [vmem:[%s4688_s27 + $0x680] sm:$0xff]   ;;  %v4535_v33 = vld [vmem:[%s4688_s27 + $0x648] sm:$0xff]  }
  0xae   : > { %4130 = vmatprep.subr.bf16.mxu1 %v4496_v34  ;;  %v4536_v34 = vld [vmem:[%s4688_s27 + $0x6c8] sm:$0xff]  }
  0xb0   : > { %4103 = vmatpush3.bf16.msra.mxu0 %v4497_v35  ;;  %v4537_v35 = vld [vmem:[%s4688_s27 + $0x608] sm:$0xff]  }
  0xb1   : > { %4131 = vmatpush3.bf16.msra.mxu1 %v4498_v36  ;;  %4144 = vmatprep.subr.bf16.mxu0 %v4499_v45  ;;  %v4538_v36 = vld [vmem:[%s4688_s27 + $0x688] sm:$0xff]  }
  0xb2   : > { %4172 = vmatprep.subr.bf16.mxu1 %v4500_v46  ;;  %v4541_v46 = vld [vmem:[%s4688_s27 + $0x610] sm:$0xff]  }
  0xb3   : > { %3084 = vmatmul.mubr.bf16.vlgmr.msra.gmra.mrb[32].mxu0 %v3556_v40  ;;  %v3592_v40 = vcombine.low %v245_v37, %v261_v38  ;;  %v4574_v38 = vld [vmem:[%s4688_s27 + $0x790] sm:$0xff]  }
  0xb4   : > { %3133 = vmatmul.mubr.bf16.vlgmr.msra.gmra.mrb[32].mxu1 %v3558_v43  ;;  %4145 = vmatpush3.bf16.msra.mxu0 %v4501_v47  ;;  %v246_v43 = vld [vmem:[%s5190_s1 + $0x158] sm:$0xff] }
  0xb5   : > { %4173 = vmatpush3.bf16.msra.mxu1 %v4502_v48  ;;  %4146 = vmatprep.subr.bf16.mxu0 %v4503_v49  ;;  %v3595_v45 = vcombine.high %v246_v43, %v262_v44  ;;  %v3594_v47 = vcombine.low %v246_v43, %v262_v44  ;;  %v4542_v48 = vld [vmem:[%s4688_s27 + $0x690] sm:$0xff]   ;;  %v4543_v49 = vld [vmem:[%s4688_s27 + $0x658] sm:$0xff]  }
  0xb6   : > { %4174 = vmatprep.subr.bf16.mxu1 %v4504_v50  ;;  %3091 = vmatprep.mubr.bf16.mxu0 %v3589_v55  ;;  %v4544_v50 = vld [vmem:[%s4688_s27 + $0x6d8] sm:$0xff]   ;;  %v4549_v55 = vld [vmem:[%s4688_s27 + $0x620] sm:$0xff]  }
  0xb7   : > { %3140 = vmatprep.mubr.bf16.mxu1 %v3591_v61  ;;  %v4555_v61 = vld [vmem:[%s4688_s27 + $0x670] sm:$0xff]   ;;  %v4576_v44 = vld [vmem:[%s4688_s27 + $0x7d8] sm:$0xff]  }
  0xb8   : > { %4147 = vmatpush3.bf16.msra.mxu0 %v4505_v51  ;;  %v4545_v51 = vld [vmem:[%s4688_s27 + $0x618] sm:$0xff]  }
  0xb9   : > { %4175 = vmatpush3.bf16.msra.mxu1 %v4506_v52  ;;  %4148 = vmatprep.subr.bf16.mxu0 %v4507_v57  ;;  %v4546_v52 = vld [vmem:[%s4688_s27 + $0x698] sm:$0xff]   ;;  %v4551_v57 = vld [vmem:[%s4688_s27 + $0x668] sm:$0xff]  }
  0xba   : > { %4176 = vmatprep.subr.bf16.mxu1 %v4508_v58  ;;  %v4552_v58 = vld [vmem:[%s4688_s27 + $0x6e8] sm:$0xff]  }
  0xbb   : > { %3092 = vmatmul.mubr.bf16.gmra.mrb[36].mxu0 %v3588_v56  ;;  %v4550_v56 = vld [vmem:[%s4688_s27 + $0x6a0] sm:$0xff]  }
  0xbc   : > { %4149 = vmatpush3.bf16.msra.mxu0 %v4509_v62  ;;  %3141 = vmatmul.mubr.bf16.gmra.mrb[36].mxu1 %v3590_v63  ;;  %v4556_v62 = vld [vmem:[%s4688_s27 + $0x6f0] sm:$0xff]  }
  0xbd   : > { %4177 = vmatpush3.bf16.msra.mxu1 %v4510_v0  ;;  %4150 = vmatprep.subr.bf16.mxu0 %v4511_v1  ;;  %v4557_v63 = vld [vmem:[%s4688_s27 + $0x630] sm:$0xff]   ;;  %v4559_v1 = vld [vmem:[%s4688_s27 + $0x678] sm:$0xff]  }
  0xbe   : > { %4178 = vmatprep.subr.bf16.mxu1 %v4512_v2  ;;  %3181 = vmatprep.mubr.bf16.mxu0 %v3561_v26  ;;  %v4558_v0 = vld [vmem:[%s4688_s27 + $0x6b0] sm:$0xff]   ;;  %v4560_v2 = vld [vmem:[%s4688_s27 + $0x6f8] sm:$0xff]  }
  0xbf   : > { %3230 = vmatprep.mubr.bf16.mxu1 %v3563_v28  ;;  %v248_v28 = vld [vmem:[%s5190_s1 + $0x168] sm:$0xff] }
  0xc0   : > { %4151 = vmatpush3.bf16.msra.mxu0 %v4513_v3  ;;  %v4561_v3 = vld [vmem:[%s4688_s27 + $0x638] sm:$0xff]  }
  0xc1   : > { %4179 = vmatpush3.bf16.msra.mxu1 %v4514_v4  ;;  %4152 = vmatprep.subr.bf16.mxu0 %v4515_v5  ;;  %v4562_v4 = vld [vmem:[%s4688_s27 + $0x6b8] sm:$0xff]   ;;  %v215_v5 = vld [vmem:[%s5190_s1 + $0x60] sm:$0xff] }
  0xc2   : > { %4180 = vmatprep.subr.bf16.mxu1 %v4516_v6  ;;  %v231_v6 = vld [vmem:[%s5190_s1 + $0xe0] sm:$0xff] }
  0xc4   : > { %4153 = vmatpush3.bf16.msra.mxu0 %v4517_v7  ;;  %v3564_v7 = vcombine.low %v215_v5, %v231_v6 }
  0xc5   : > { %4181 = vmatpush3.bf16.msra.mxu1 %v4518_v8  ;;  %4154 = vmatprep.subr.bf16.mxu0 %v4519_v9  ;;  %v3565_v8 = vcombine.high %v215_v5, %v231_v6  ;;  %v216_v9 = vld [vmem:[%s5190_s1 + $0x68] sm:$0xff] }
  0xc6   : > { %4182 = vmatprep.subr.bf16.mxu1 %v4520_v10  ;;  %v232_v10 = vld [vmem:[%s5190_s1 + $0xe8] sm:$0xff] }
  0xc7   : > { %v4585_v5 = vld [vmem:[%s4688_s27 + $0x728] sm:$0xff]  }
  0xc8   : > { %4155 = vmatpush3.bf16.msra.mxu0 %v4521_v11  ;;  %v3566_v11 = vcombine.low %v216_v9, %v232_v10 }
  0xc9   : > { %4183 = vmatpush3.bf16.msra.mxu1 %v4522_v12  ;;  %4156 = vmatprep.subr.bf16.mxu0 %v4523_v13  ;;  %v3567_v12 = vcombine.high %v216_v9, %v232_v10  ;;  %v4563_v13 = vld [vmem:[%s4688_s27 + $0x740] sm:$0xff]   ;;  %v4587_v10 = vld [vmem:[%s4688_s27 + $0x770] sm:$0xff]  }
  0xca   : > { %4184 = vmatprep.subr.bf16.mxu1 %v4524_v14  ;;  %v4564_v14 = vld [vmem:[%s4688_s27 + $0x7c0] sm:$0xff]  }
  0xcc   : > { %4157 = vmatpush3.bf16.msra.mxu0 %v4525_v15  ;;  %v4565_v15 = vld [vmem:[%s4688_s27 + $0x700] sm:$0xff]  }
  0xcd   : > { %4185 = vmatpush3.bf16.msra.mxu1 %v4526_v16  ;;  %4158 = vmatprep.subr.bf16.mxu0 %v4527_v17  ;;  %v4566_v16 = vld [vmem:[%s4688_s27 + $0x780] sm:$0xff]   ;;  %v4567_v17 = vld [vmem:[%s4688_s27 + $0x748] sm:$0xff]  }
  0xce   : > { %4186 = vmatprep.subr.bf16.mxu1 %v4528_v18  ;;  %v4568_v18 = vld [vmem:[%s4688_s27 + $0x7c8] sm:$0xff]  }
  0xd0   : > { %4159 = vmatpush3.bf16.msra.mxu0 %v4529_v19  ;;  %v4569_v19 = vld [vmem:[%s4688_s27 + $0x708] sm:$0xff]  }
  0xd1   : > { %4187 = vmatpush3.bf16.msra.mxu1 %v4530_v20  ;;  %4200 = vmatprep.subr.bf16.mxu0 %v4531_v29  ;;  %v4570_v20 = vld [vmem:[%s4688_s27 + $0x788] sm:$0xff]  }
  0xd2   : > { %4228 = vmatprep.subr.bf16.mxu1 %v4532_v30  ;;  %v264_v29 = vld [vmem:[%s5190_s1 + $0x1e8] sm:$0xff] }
  0xd3   : > { %3182 = vmatmul.mubr.bf16.vlgmr.msra.gmra.mrb[40].mxu0 %v3560_v25  ;;  %v4571_v25 = vld [vmem:[%s4688_s27 + $0x750] sm:$0xff]  }
  0xd4   : > { %3231 = vmatmul.mubr.bf16.vlgmr.msra.gmra.mrb[40].mxu1 %v3562_v27  ;;  %4201 = vmatpush3.bf16.msra.mxu0 %v4533_v31  ;;  %v4572_v27 = vld [vmem:[%s4688_s27 + $0x7d0] sm:$0xff]  }
  0xd5   : > { %4229 = vmatpush3.bf16.msra.mxu1 %v4534_v32  ;;  %4202 = vmatprep.subr.bf16.mxu0 %v4535_v33  ;;  %v3599_v32 = vcombine.high %v248_v28, %v264_v29  ;;  %v4573_v33 = vld [vmem:[%s4688_s27 + $0x710] sm:$0xff]  }
  0xd6   : > { %4230 = vmatprep.subr.bf16.mxu1 %v4536_v34  ;;  %3189 = vmatprep.mubr.bf16.mxu0 %v3593_v39  ;;  %v3598_v34 = vcombine.low %v248_v28, %v264_v29 }
  0xd7   : > { %3238 = vmatprep.mubr.bf16.mxu1 %v3595_v45 }
  0xd8   : > { %4203 = vmatpush3.bf16.msra.mxu0 %v4537_v35 }
  0xd9   : > { %4231 = vmatpush3.bf16.msra.mxu1 %v4538_v36  ;;  %4204 = vmatprep.subr.bf16.mxu0 %v4539_v41  ;;  %v786_v35 = vpop.permute.xlu0 %785  ;;  %v4575_v41 = vld [vmem:[%s4688_s27 + $0x758] sm:$0xff]  }
  0xda   : > { %4232 = vmatprep.subr.bf16.mxu1 %v4540_v42 }
  0xdb   : > { %3190 = vmatmul.mubr.bf16.gmra.mrb[44].mxu0 %v3592_v40 }
  0xdc   : > { %4205 = vmatpush3.bf16.msra.mxu0 %v4541_v46  ;;  %3239 = vmatmul.mubr.bf16.gmra.mrb[44].mxu1 %v3594_v47  ;;  %v4577_v46 = vld [vmem:[%s4688_s27 + $0x718] sm:$0xff]  }
  0xdd   : > { %4233 = vmatpush3.bf16.msra.mxu1 %v4542_v48  ;;  %4206 = vmatprep.subr.bf16.mxu0 %v4543_v49 }
  0xde   : > { %4234 = vmatprep.subr.bf16.mxu1 %v4544_v50  ;;  %3279 = vmatprep.mubr.bf16.mxu0 %v3565_v8  ;;  %v791_v50 = vpop.permute.xlu0 %790  ;;  %v4586_v8 = vld [vmem:[%s4688_s27 + $0x7a8] sm:$0xff]  }
  0xdf   : > { %3328 = vmatprep.mubr.bf16.mxu1 %v3567_v12  ;;  %v4588_v12 = vld [vmem:[%s4688_s27 + $0x7f0] sm:$0xff]  }
  0xe0   : > { %4207 = vmatpush3.bf16.msra.mxu0 %v4545_v51  ;;  %v4578_v51 = vld [vmem:[%s4688_s27 + $0x798] sm:$0xff]  }
  0xe1   : > { %4235 = vmatpush3.bf16.msra.mxu1 %v4546_v52  ;;  %4208 = vmatprep.subr.bf16.mxu0 %v4547_v53  ;;  %v4579_v53 = vld [vmem:[%s4688_s27 + $0x760] sm:$0xff]  }
  0xe2   : > { %4236 = vmatprep.subr.bf16.mxu1 %v4548_v54 }
  0xe4   : > { %4209 = vmatpush3.bf16.msra.mxu0 %v4549_v55 }
  0xe5   : > { %4237 = vmatpush3.bf16.msra.mxu1 %v4550_v56  ;;  %4210 = vmatprep.subr.bf16.mxu0 %v4551_v57  ;;  %v4580_v56 = vld [vmem:[%s4688_s27 + $0x7e0] sm:$0xff]  }
  0xe6   : > { %4238 = vmatprep.subr.bf16.mxu1 %v4552_v58  ;;  %v4581_v58 = vld [vmem:[%s4688_s27 + $0x720] sm:$0xff]  }
  0xe8   : > { %4211 = vmatpush3.bf16.msra.mxu0 %v4553_v59 }
  0xe9   : > { %4239 = vmatpush3.bf16.msra.mxu1 %v4554_v60  ;;  %4212 = vmatprep.subr.bf16.mxu0 %v4555_v61 }
  0xea   : > { %4240 = vmatprep.subr.bf16.mxu1 %v4556_v62  ;;  %v4582_v62 = vld [vmem:[%s4688_s27 + $0x7a0] sm:$0xff]  }
  0xec   : > { %4213 = vmatpush3.bf16.msra.mxu0 %v4557_v63 }
  0xed   : > { %4241 = vmatpush3.bf16.msra.mxu1 %v4558_v0  ;;  %4214 = vmatprep.subr.bf16.mxu0 %v4559_v1  ;;  %v4583_v0 = vld [vmem:[%s4688_s27 + $0x768] sm:$0xff]  }
  0xee   : > { %4242 = vmatprep.subr.bf16.mxu1 %v4560_v2  ;;  %v4584_v2 = vld [vmem:[%s4688_s27 + $0x7e8] sm:$0xff]  }
  0xf0   : > { %4215 = vmatpush3.bf16.msra.mxu0 %v4561_v3 }
  0xf1   : > { %4243 = vmatpush3.bf16.msra.mxu1 %v4562_v4  ;;  %4256 = vmatprep.subr.bf16.mxu0 %v4563_v13  ;;  %v4589_v13 = vld [vmem:[%s4688_s27 + $0x730] sm:$0xff]  }
  0xf2   : > { %4284 = vmatprep.subr.bf16.mxu1 %v4564_v14  ;;  %v4590_v14 = vld [vmem:[%s4688_s27 + $0x7b0] sm:$0xff]  }
  0xf3   : > { %3280 = vmatmul.mubr.bf16.vlgmr.msra.gmra.mrb[48].mxu0 %v3564_v7 }
  0xf4   : > { %3329 = vmatmul.mubr.bf16.vlgmr.msra.gmra.mrb[48].mxu1 %v3566_v11  ;;  %4257 = vmatpush3.bf16.msra.mxu0 %v4565_v15  ;;  %v4591_v15 = vld [vmem:[%s4688_s27 + $0x778] sm:$0xff]  }
  0xf5   : > { %4285 = vmatpush3.bf16.msra.mxu1 %v4566_v16  ;;  %4258 = vmatprep.subr.bf16.mxu0 %v4567_v17  ;;  %v4592_v16 = vld [vmem:[%s4688_s27 + $0x7f8] sm:$0xff]  }
  0xf6   : > { %4286 = vmatprep.subr.bf16.mxu1 %v4568_v18  ;;  %3287 = vmatprep.mubr.bf16.mxu0 %v3597_v23  ;;  %v4593_v17 = vld [vmem:[%s4688_s27 + $0x738] sm:$0xff]  }
  0xf7   : > { %3336 = vmatprep.mubr.bf16.mxu1 %v3599_v32  ;;  %v4594_v18 = vld [vmem:[%s4688_s27 + $0x7b8] sm:$0xff]  }
  0xf8   : > { %4259 = vmatpush3.bf16.msra.mxu0 %v4569_v19  ;;  %v217_v19 = vld [vmem:[%s5190_s1 + $0x70] sm:$0xff] }
  0xf9   : > { %4287 = vmatpush3.bf16.msra.mxu1 %v4570_v20  ;;  %4260 = vmatprep.subr.bf16.mxu0 %v4571_v25  ;;  %v233_v20 = vld [vmem:[%s5190_s1 + $0xf0] sm:$0xff] }
  0xfa   : > { %4288 = vmatprep.subr.bf16.mxu1 %v4572_v27  ;;  %v3568_v22 = vcombine.low %v217_v19, %v233_v20  ;;  %v3569_v23 = vcombine.high %v217_v19, %v233_v20  ;;  %v249_v25 = vld [vmem:[%s5190_s1 + $0x170] sm:$0xff] }
  0xfb   : > { %3288 = vmatmul.mubr.bf16.gmra.mrb[52].mxu0 %v3596_v24  ;;  %v234_v24 = vld [vmem:[%s5190_s1 + $0xf8] sm:$0xff] }
  0xfc   : > { %4261 = vmatpush3.bf16.msra.mxu0 %v4573_v33  ;;  %3337 = vmatmul.mubr.bf16.gmra.mrb[52].mxu1 %v3598_v34  ;;  %v3570_v27 = vcombine.low %v218_v21, %v234_v24  ;;  %v3571_v28 = vcombine.high %v218_v21, %v234_v24  ;;  %v796_v33 = vpop.permute.xlu1 %795 }
  0xfd   : > { %4289 = vmatpush3.bf16.msra.mxu1 %v4574_v38  ;;  %4262 = vmatprep.subr.bf16.mxu0 %v4575_v41 }
  0xfe   : > { %4290 = vmatprep.subr.bf16.mxu1 %v4576_v44  ;;  %3377 = vmatprep.mubr.bf16.mxu0 %v3569_v23 }
  0xff   : > { %3426 = vmatprep.mubr.bf16.mxu1 %v3571_v28 }
 0x100   : > { %4263 = vmatpush3.bf16.msra.mxu0 %v4577_v46 }
 0x101   : > { %4291 = vmatpush3.bf16.msra.mxu1 %v4578_v51  ;;  %4264 = vmatprep.subr.bf16.mxu0 %v4579_v53 }
 0x102   : > { %4292 = vmatprep.subr.bf16.mxu1 %v4580_v56 }
 0x104   : > { %4265 = vmatpush3.bf16.msra.mxu0 %v4581_v58 }
 0x105   : > { %4293 = vmatpush3.bf16.msra.mxu1 %v4582_v62  ;;  %4266 = vmatprep.subr.bf16.mxu0 %v4583_v0 }
 0x106   : > { %v3880_v26 = vpop.f32.mrb[0].mxu0  ;;  %4294 = vmatprep.subr.bf16.mxu1 %v4584_v2 }
 0x107   : > { %v3908_v30 = vpop.f32.mrb[0].mxu1  ;;  %v3881_v31 = vpop.f32.mrb[1].mxu0 }
 0x108   : > { %v3882_v36 = vadd.f32 %v3881_v31, %v3880_v26  ;;  %v3909_v37 = vpop.f32.mrb[1].mxu1  ;;  %v3883_v40 = vpop.f32.mrb[2].mxu0  ;;  %4267 = vmatpush3.bf16.msra.mxu0 %v4585_v5  ;;  %v265_v26 = vld [vmem:[%s5190_s1 + $0x1f0] sm:$0xff]  ;;  %v266_v31 = vld [vmem:[%s5190_s1 + $0x1f8] sm:$0xff] }
 0x109   : > { %v3910_v39 = vadd.f32 %v3909_v37, %v3908_v30  ;;  %v3911_v43 = vpop.f32.mrb[2].mxu1  ;;  %v3884_v45 = vpop.f32.mrb[3].mxu0  ;;  %4295 = vmatpush3.bf16.msra.mxu1 %v4586_v8  ;;  %4268 = vmatprep.subr.bf16.mxu0 %v4587_v10  ;;  %v3601_v29 = vcombine.high %v249_v25, %v265_v26  ;;  %v250_v30 = vld [vmem:[%s5190_s1 + $0x178] sm:$0xff] }
 0x10a   : > { %v2694_v42 = vadd.f32 %v3882_v36, %v786_v35  ;;  %v3885_v48 = vadd.f32 %v3884_v45, %v3883_v40  ;;  %v3912_v49 = vpop.f32.mrb[3].mxu1  ;;  %4296 = vmatprep.subr.bf16.mxu1 %v4588_v12  ;;  %v3603_v32 = vcombine.high %v250_v30, %v266_v31  ;;  %v3600_v36 = vcombine.low %v249_v25, %v265_v26  ;;  %v801_v37 = vpop.permute.xlu1 %800 }
 0x10b   : > { %v3913_v52 = vadd.f32 %v3912_v49, %v3911_v43 }
 0x10c   : > { %v5125_v47 = vadd.f32 %v3910_v39, %v2694_v42  ;;  %v2697_v54 = vadd.f32 %v3885_v48, %v791_v50  ;;  %4269 = vmatpush3.bf16.msra.mxu0 %v4589_v13  ;;  %v3602_v39 = vcombine.low %v250_v30, %v266_v31 }
 0x10d   : > { %4297 = vmatpush3.bf16.msra.mxu1 %v4590_v14  ;;  %4270 = vmatprep.subr.bf16.mxu0 %v4591_v15 }
 0x10e   : > { %v3886_v55 = vpop.f32.mrb[4].mxu0  ;;  %v5131_v59 = vadd.f32 %v3913_v52, %v2697_v54  ;;  %4298 = vmatprep.subr.bf16.mxu1 %v4592_v16 }
 0x10f   : > { %v3887_v57 = vpop.f32.mrb[5].mxu0  ;;  %v3914_v63 = vpop.f32.mrb[4].mxu1 }
 0x110   : > { %v3888_v60 = vadd.f32 %v3887_v57, %v3886_v55  ;;  %v3889_v61 = vpop.f32.mrb[6].mxu0  ;;  %v3915_v4 = vpop.f32.mrb[5].mxu1  ;;  %4271 = vmatpush3.bf16.msra.mxu0 %v4593_v17 }
 0x111   : > { %v3890_v1 = vpop.f32.mrb[7].mxu0  ;;  %v3916_v6 = vadd.f32 %v3915_v4, %v3914_v63  ;;  %v3917_v7 = vpop.f32.mrb[6].mxu1  ;;  %4299 = vmatpush3.bf16.msra.mxu1 %v4594_v18 }
 0x112   : > { %v3891_v3 = vadd.f32 %v3890_v1, %v3889_v61  ;;  %v3918_v9 = vpop.f32.mrb[7].mxu1  ;;  %v2702_v34 = vadd.f32 %v3888_v60, %v796_v33 }
 0x113   : > { %v3919_v11 = vadd.f32 %v3918_v9, %v3917_v7  ;;  %3378 = vmatmul.mubr.bf16.vlgmr.msra.gmra.mrb[56].mxu0 %v3568_v22 }
 0x114   : > { %3427 = vmatmul.mubr.bf16.vlgmr.msra.gmra.mrb[56].mxu1 %v3570_v27  ;;  %3385 = vmatprep.mubr.bf16.mxu0 %v3601_v29  ;;  %v2751_v35 = vadd.f32 %v3916_v6, %v2702_v34  ;;  %v2705_v40 = vadd.f32 %v3891_v3, %v801_v37 }
 0x115   : > { %3434 = vmatprep.mubr.bf16.mxu1 %v3603_v32 }
 0x116   : > { %v2754_v46 = vadd.f32 %v3919_v11, %v2705_v40 }
 0x11b   : > { %3386 = vmatmul.mubr.bf16.gmra.mrb[60].mxu0 %v3600_v36 }
 0x11c   : > { %3435 = vmatmul.mubr.bf16.gmra.mrb[60].mxu1 %v3602_v39 }
 0x126   : > { %v3936_v38 = vpop.f32.mrb[8].mxu0 }
 0x127   : > { %v3964_v41 = vpop.f32.mrb[8].mxu1  ;;  %v3937_v42 = vpop.f32.mrb[9].mxu0 }
 0x128   : > { %v3938_v43 = vadd.f32 %v3937_v42, %v3936_v38  ;;  %v3965_v44 = vpop.f32.mrb[9].mxu1  ;;  %v3939_v45 = vpop.f32.mrb[10].mxu0 }
 0x129   : > { %v3966_v48 = vadd.f32 %v3965_v44, %v3964_v41  ;;  %v3967_v49 = vpop.f32.mrb[10].mxu1  ;;  %v3940_v50 = vpop.f32.mrb[11].mxu0 }
 0x12a   : > { %v2792_v51 = vadd.f32 %v3938_v43, %v5125_v47  ;;  %v3941_v52 = vadd.f32 %v3940_v50, %v3939_v45  ;;  %v3968_v53 = vpop.f32.mrb[11].mxu1 }
 0x12b   : > { %v3969_v54 = vadd.f32 %v3968_v53, %v3967_v49 }
 0x12c   : > { %v2841_v55 = vadd.f32 %v3966_v48, %v2792_v51  ;;  %v2795_v56 = vadd.f32 %v3941_v52, %v5131_v59 }
 0x12e   : > { %v2844_v57 = vadd.f32 %v3969_v54, %v2795_v56  ;;  %v3942_v58 = vpop.f32.mrb[12].mxu0 }
 0x12f   : > { %v3943_v60 = vpop.f32.mrb[13].mxu0  ;;  %v3970_v61 = vpop.f32.mrb[12].mxu1 }
 0x130   : > { %v3944_v62 = vadd.f32 %v3943_v60, %v3942_v58  ;;  %v3945_v63 = vpop.f32.mrb[14].mxu0  ;;  %v3971_v0 = vpop.f32.mrb[13].mxu1 }
 0x131   : > { %v3946_v1 = vpop.f32.mrb[15].mxu0  ;;  %v3972_v2 = vadd.f32 %v3971_v0, %v3970_v61  ;;  %v3973_v3 = vpop.f32.mrb[14].mxu1 }
 0x132   : > { %v2800_v4 = vadd.f32 %v3944_v62, %v2751_v35  ;;  %v3947_v5 = vadd.f32 %v3946_v1, %v3945_v63  ;;  %v3974_v47 = vpop.f32.mrb[15].mxu1 }
 0x133   : > { %v3975_v6 = vadd.f32 %v3974_v47, %v3973_v3 }
 0x134   : > { %v2803_v7 = vadd.f32 %v3947_v5, %v2754_v46  ;;  %v2849_v8 = vadd.f32 %v3972_v2, %v2800_v4 }
 0x136   : > { %v2852_v9 = vadd.f32 %v3975_v6, %v2803_v7 }
 0x146   : > { %v3992_v10 = vpop.f32.mrb[16].mxu0 }
 0x147   : > { %v4020_v11 = vpop.f32.mrb[16].mxu1  ;;  %v3993_v59 = vpop.f32.mrb[17].mxu0 }
 0x148   : > { %v3994_v12 = vadd.f32 %v3993_v59, %v3992_v10  ;;  %v4021_v13 = vpop.f32.mrb[17].mxu1  ;;  %v3995_v14 = vpop.f32.mrb[18].mxu0 }
 0x149   : > { %v4022_v15 = vadd.f32 %v4021_v13, %v4020_v11  ;;  %v4023_v16 = vpop.f32.mrb[18].mxu1  ;;  %v3996_v17 = vpop.f32.mrb[19].mxu0 }
 0x14a   : > { %v2890_v18 = vadd.f32 %v3994_v12, %v2841_v55  ;;  %v3997_v19 = vadd.f32 %v3996_v17, %v3995_v14  ;;  %v4024_v20 = vpop.f32.mrb[19].mxu1 }
 0x14b   : > { %v4025_v21 = vadd.f32 %v4024_v20, %v4023_v16 }
 0x14c   : > { %v2939_v22 = vadd.f32 %v4022_v15, %v2890_v18  ;;  %v2893_v23 = vadd.f32 %v3997_v19, %v2844_v57 }
 0x14e   : > { %v2942_v24 = vadd.f32 %v4025_v21, %v2893_v23  ;;  %v3998_v25 = vpop.f32.mrb[20].mxu0 }
 0x14f   : > { %v3999_v26 = vpop.f32.mrb[21].mxu0  ;;  %v4026_v29 = vpop.f32.mrb[20].mxu1 }
 0x150   : > { %v4000_v27 = vadd.f32 %v3999_v26, %v3998_v25  ;;  %v4001_v28 = vpop.f32.mrb[22].mxu0  ;;  %v4027_v33 = vpop.f32.mrb[21].mxu1 }
 0x151   : > { %v4002_v30 = vpop.f32.mrb[23].mxu0  ;;  %v4028_v34 = vadd.f32 %v4027_v33, %v4026_v29  ;;  %v4029_v35 = vpop.f32.mrb[22].mxu1 }
 0x152   : > { %v2898_v31 = vadd.f32 %v4000_v27, %v2849_v8  ;;  %v4003_v32 = vadd.f32 %v4002_v30, %v4001_v28  ;;  %v4030_v37 = vpop.f32.mrb[23].mxu1 }
 0x153   : > { %v4031_v39 = vadd.f32 %v4030_v37, %v4029_v35 }
 0x154   : > { %v2901_v36 = vadd.f32 %v4003_v32, %v2852_v9  ;;  %v2947_v38 = vadd.f32 %v4028_v34, %v2898_v31 }
 0x156   : > { %v2950_v40 = vadd.f32 %v4031_v39, %v2901_v36 }
 0x166   : > { %v4048_v41 = vpop.f32.mrb[24].mxu0 }
 0x167   : > { %v4076_v42 = vpop.f32.mrb[24].mxu1  ;;  %v4049_v43 = vpop.f32.mrb[25].mxu0 }
 0x168   : > { %v4077_v44 = vpop.f32.mrb[25].mxu1  ;;  %v4050_v45 = vadd.f32 %v4049_v43, %v4048_v41  ;;  %v4051_v48 = vpop.f32.mrb[26].mxu0 }
 0x169   : > { %v4078_v46 = vadd.f32 %v4077_v44, %v4076_v42  ;;  %v4079_v49 = vpop.f32.mrb[26].mxu1  ;;  %v4052_v50 = vpop.f32.mrb[27].mxu0 }
 0x16a   : > { %v4080_v51 = vpop.f32.mrb[27].mxu1  ;;  %v2988_v52 = vadd.f32 %v4050_v45, %v2939_v22  ;;  %v4053_v53 = vadd.f32 %v4052_v50, %v4051_v48 }
 0x16b   : > { %v4081_v54 = vadd.f32 %v4080_v51, %v4079_v49 }
 0x16c   : > { %v3037_v55 = vadd.f32 %v4078_v46, %v2988_v52  ;;  %v2991_v56 = vadd.f32 %v4053_v53, %v2942_v24 }
 0x16e   : > { %v3040_v57 = vadd.f32 %v4081_v54, %v2991_v56  ;;  %v4054_v58 = vpop.f32.mrb[28].mxu0 }
 0x16f   : > { %v4055_v60 = vpop.f32.mrb[29].mxu0  ;;  %v4082_v1 = vpop.f32.mrb[28].mxu1 }
 0x170   : > { %v4056_v61 = vadd.f32 %v4055_v60, %v4054_v58  ;;  %v4057_v62 = vpop.f32.mrb[30].mxu0  ;;  %v4083_v3 = vpop.f32.mrb[29].mxu1 }
 0x171   : > { %v4058_v63 = vpop.f32.mrb[31].mxu0  ;;  %v4084_v5 = vadd.f32 %v4083_v3, %v4082_v1  ;;  %v4085_v47 = vpop.f32.mrb[30].mxu1 }
 0x172   : > { %v2996_v0 = vadd.f32 %v4056_v61, %v2947_v38  ;;  %v4059_v2 = vadd.f32 %v4058_v63, %v4057_v62  ;;  %v4086_v6 = vpop.f32.mrb[31].mxu1 }
 0x173   : > { %v4087_v8 = vadd.f32 %v4086_v6, %v4085_v47 }
 0x174   : > { %v2999_v4 = vadd.f32 %v4059_v2, %v2950_v40  ;;  %v3045_v7 = vadd.f32 %v4084_v5, %v2996_v0 }
 0x176   : > { %v3048_v9 = vadd.f32 %v4087_v8, %v2999_v4 }
 0x186   : > { %v4104_v10 = vpop.f32.mrb[32].mxu0 }
 0x187   : > { %v4132_v11 = vpop.f32.mrb[32].mxu1  ;;  %v4105_v59 = vpop.f32.mrb[33].mxu0 }
 0x188   : > { %v4106_v12 = vadd.f32 %v4105_v59, %v4104_v10  ;;  %v4133_v13 = vpop.f32.mrb[33].mxu1  ;;  %v4107_v14 = vpop.f32.mrb[34].mxu0 }
 0x189   : > { %v4134_v15 = vadd.f32 %v4133_v13, %v4132_v11  ;;  %v4135_v16 = vpop.f32.mrb[34].mxu1  ;;  %v4108_v17 = vpop.f32.mrb[35].mxu0 }
 0x18a   : > { %v3086_v18 = vadd.f32 %v4106_v12, %v3037_v55  ;;  %v4109_v19 = vadd.f32 %v4108_v17, %v4107_v14  ;;  %v4136_v20 = vpop.f32.mrb[35].mxu1 }
 0x18b   : > { %v4137_v21 = vadd.f32 %v4136_v20, %v4135_v16 }
 0x18c   : > { %v3135_v22 = vadd.f32 %v4134_v15, %v3086_v18  ;;  %v3089_v23 = vadd.f32 %v4109_v19, %v3040_v57 }
 0x18e   : > { %v3138_v24 = vadd.f32 %v4137_v21, %v3089_v23  ;;  %v4110_v25 = vpop.f32.mrb[36].mxu0 }
 0x18f   : > { %v4111_v26 = vpop.f32.mrb[37].mxu0  ;;  %v4138_v31 = vpop.f32.mrb[36].mxu1 }
 0x190   : > { %v4112_v27 = vadd.f32 %v4111_v26, %v4110_v25  ;;  %v4113_v28 = vpop.f32.mrb[38].mxu0  ;;  %v4139_v33 = vpop.f32.mrb[37].mxu1 }
 0x191   : > { %v4114_v29 = vpop.f32.mrb[39].mxu0  ;;  %v4140_v35 = vadd.f32 %v4139_v33, %v4138_v31  ;;  %v4141_v36 = vpop.f32.mrb[38].mxu1 }
 0x192   : > { %v3094_v30 = vadd.f32 %v4112_v27, %v3045_v7  ;;  %v4115_v32 = vadd.f32 %v4114_v29, %v4113_v28  ;;  %v4142_v37 = vpop.f32.mrb[39].mxu1 }
 0x193   : > { %v4143_v39 = vadd.f32 %v4142_v37, %v4141_v36 }
 0x194   : > { %v3097_v34 = vadd.f32 %v4115_v32, %v3048_v9  ;;  %v3143_v38 = vadd.f32 %v4140_v35, %v3094_v30 }
 0x196   : > { %v3146_v40 = vadd.f32 %v4143_v39, %v3097_v34 }
 0x1a6   : > { %v4160_v41 = vpop.f32.mrb[40].mxu0 }
 0x1a7   : > { %v4188_v42 = vpop.f32.mrb[40].mxu1  ;;  %v4161_v43 = vpop.f32.mrb[41].mxu0 }
 0x1a8   : > { %v4189_v44 = vpop.f32.mrb[41].mxu1  ;;  %v4162_v45 = vadd.f32 %v4161_v43, %v4160_v41  ;;  %v4163_v48 = vpop.f32.mrb[42].mxu0 }
 0x1a9   : > { %v4190_v46 = vadd.f32 %v4189_v44, %v4188_v42  ;;  %v4191_v49 = vpop.f32.mrb[42].mxu1  ;;  %v4164_v50 = vpop.f32.mrb[43].mxu0 }
 0x1aa   : > { %v4192_v51 = vpop.f32.mrb[43].mxu1  ;;  %v3184_v52 = vadd.f32 %v4162_v45, %v3135_v22  ;;  %v4165_v53 = vadd.f32 %v4164_v50, %v4163_v48 }
 0x1ab   : > { %v4193_v54 = vadd.f32 %v4192_v51, %v4191_v49 }
 0x1ac   : > { %v3233_v55 = vadd.f32 %v4190_v46, %v3184_v52  ;;  %v3187_v56 = vadd.f32 %v4165_v53, %v3138_v24 }
 0x1ae   : > { %v3236_v57 = vadd.f32 %v4193_v54, %v3187_v56  ;;  %v4166_v58 = vpop.f32.mrb[44].mxu0 }
 0x1af   : > { %v4167_v60 = vpop.f32.mrb[45].mxu0  ;;  %v4194_v1 = vpop.f32.mrb[44].mxu1 }
 0x1b0   : > { %v4168_v61 = vadd.f32 %v4167_v60, %v4166_v58  ;;  %v4169_v62 = vpop.f32.mrb[46].mxu0  ;;  %v4195_v3 = vpop.f32.mrb[45].mxu1 }
 0x1b1   : > { %v4170_v63 = vpop.f32.mrb[47].mxu0  ;;  %v4196_v5 = vadd.f32 %v4195_v3, %v4194_v1  ;;  %v4197_v47 = vpop.f32.mrb[46].mxu1 }
 0x1b2   : > { %v3192_v0 = vadd.f32 %v4168_v61, %v3143_v38  ;;  %v4171_v2 = vadd.f32 %v4170_v63, %v4169_v62  ;;  %v4198_v6 = vpop.f32.mrb[47].mxu1 }
 0x1b3   : > { %v4199_v8 = vadd.f32 %v4198_v6, %v4197_v47 }
 0x1b4   : > { %v3195_v4 = vadd.f32 %v4171_v2, %v3146_v40  ;;  %v3241_v7 = vadd.f32 %v4196_v5, %v3192_v0 }
 0x1b6   : > { %v3244_v9 = vadd.f32 %v4199_v8, %v3195_v4 }
 0x1c6   : > { %v4216_v10 = vpop.f32.mrb[48].mxu0 }
 0x1c7   : > { %v4244_v11 = vpop.f32.mrb[48].mxu1  ;;  %v4217_v59 = vpop.f32.mrb[49].mxu0 }
 0x1c8   : > { %v4218_v12 = vadd.f32 %v4217_v59, %v4216_v10  ;;  %v4245_v13 = vpop.f32.mrb[49].mxu1  ;;  %v4219_v14 = vpop.f32.mrb[50].mxu0 }
 0x1c9   : > { %v4246_v15 = vadd.f32 %v4245_v13, %v4244_v11  ;;  %v4247_v16 = vpop.f32.mrb[50].mxu1  ;;  %v4220_v17 = vpop.f32.mrb[51].mxu0 }
 0x1ca   : > { %v3282_v18 = vadd.f32 %v4218_v12, %v3233_v55  ;;  %v4221_v19 = vadd.f32 %v4220_v17, %v4219_v14  ;;  %v4248_v20 = vpop.f32.mrb[51].mxu1 }
 0x1cb   : > { %v4249_v21 = vadd.f32 %v4248_v20, %v4247_v16 }
 0x1cc   : > { %v3331_v22 = vadd.f32 %v4246_v15, %v3282_v18  ;;  %v3285_v23 = vadd.f32 %v4221_v19, %v3236_v57 }
 0x1ce   : > { %v3334_v24 = vadd.f32 %v4249_v21, %v3285_v23  ;;  %v4222_v25 = vpop.f32.mrb[52].mxu0 }
 0x1cf   : > { %v4223_v26 = vpop.f32.mrb[53].mxu0  ;;  %v4250_v29 = vpop.f32.mrb[52].mxu1 }
 0x1d0   : > { %v4224_v27 = vadd.f32 %v4223_v26, %v4222_v25  ;;  %v4225_v28 = vpop.f32.mrb[54].mxu0  ;;  %v4251_v33 = vpop.f32.mrb[53].mxu1 }
 0x1d1   : > { %v4226_v30 = vpop.f32.mrb[55].mxu0  ;;  %v4252_v34 = vadd.f32 %v4251_v33, %v4250_v29  ;;  %v4253_v35 = vpop.f32.mrb[54].mxu1 }
 0x1d2   : > { %v3290_v31 = vadd.f32 %v4224_v27, %v3241_v7  ;;  %v4227_v32 = vadd.f32 %v4226_v30, %v4225_v28  ;;  %v4254_v37 = vpop.f32.mrb[55].mxu1 }
 0x1d3   : > { %v4255_v39 = vadd.f32 %v4254_v37, %v4253_v35 }
 0x1d4   : > { %v3293_v36 = vadd.f32 %v4227_v32, %v3244_v9  ;;  %v3339_v38 = vadd.f32 %v4252_v34, %v3290_v31 }
 0x1d6   : > { %v3342_v40 = vadd.f32 %v4255_v39, %v3293_v36 }
 0x1e6   : > { %v4272_v41 = vpop.f32.mrb[56].mxu0 }
 0x1e7   : > { %v4300_v42 = vpop.f32.mrb[56].mxu1  ;;  %v4273_v43 = vpop.f32.mrb[57].mxu0 }
 0x1e8   : > { %v4274_v44 = vadd.f32 %v4273_v43, %v4272_v41  ;;  %v4301_v45 = vpop.f32.mrb[57].mxu1  ;;  %v4275_v46 = vpop.f32.mrb[58].mxu0 }
 0x1e9   : > { %v4302_v48 = vadd.f32 %v4301_v45, %v4300_v42  ;;  %v4303_v49 = vpop.f32.mrb[58].mxu1  ;;  %v4276_v50 = vpop.f32.mrb[59].mxu0 }
 0x1ea   : > { %v3380_v51 = vadd.f32 %v4274_v44, %v3331_v22  ;;  %v4277_v52 = vadd.f32 %v4276_v50, %v4275_v46  ;;  %v4304_v53 = vpop.f32.mrb[59].mxu1 }
 0x1eb   : > { %v4305_v54 = vadd.f32 %v4304_v53, %v4303_v49 }
 0x1ec   : > { %v3429_v55 = vadd.f32 %v4302_v48, %v3380_v51  ;;  %v3383_v56 = vadd.f32 %v4277_v52, %v3334_v24 }
 0x1ee   : > { %3444 = vst.msk [vmem:[%s201_s25] sm:$0xff] %vm3443_vm0, %v3429_v55  ;;  %v3432_v57 = vadd.f32 %v4305_v54, %v3383_v56  ;;  %v4278_v58 = vpop.f32.mrb[60].mxu0 }
 0x1ef   : > { %v4306_v60 = vpop.f32.mrb[60].mxu1  ;;  %v4279_v61 = vpop.f32.mrb[61].mxu0 }
 0x1f0   : > { %3445 = vst.msk [vmem:[%s201_s25 + $0x8] sm:$0xff] %vm3443_vm0, %v3432_v57  ;;  %v4280_v62 = vadd.f32 %v4279_v61, %v4278_v58  ;;  %v4307_v63 = vpop.f32.mrb[61].mxu1  ;;  %v4281_v0 = vpop.f32.mrb[62].mxu0 }
 0x1f1   : > { %v4308_v1 = vadd.f32 %v4307_v63, %v4306_v60  ;;  %v4309_v2 = vpop.f32.mrb[62].mxu1  ;;  %v4282_v3 = vpop.f32.mrb[63].mxu0 }
 0x1f2   : > { %v3388_v4 = vadd.f32 %v4280_v62, %v3339_v38  ;;  %v4283_v5 = vadd.f32 %v4282_v3, %v4281_v0  ;;  %v4310_v47 = vpop.f32.mrb[63].mxu1 }
 0x1f3   : > { %v4311_v6 = vadd.f32 %v4310_v47, %v4309_v2 }
 0x1f4   : > { %v3437_v7 = vadd.f32 %v4308_v1, %v3388_v4  ;;  %v3391_v8 = vadd.f32 %v4283_v5, %v3342_v40 }
 0x1f6   : > { %3446 = vst.msk [vmem:[%s201_s25 + $0x10] sm:$0xff] %vm3443_vm0, %v3437_v7  ;;  %v3440_v9 = vadd.f32 %v4311_v6, %v3391_v8 }
 0x1f8   : > { %3447 = vst.msk [vmem:[%s201_s25 + $0x18] sm:$0xff] %vm3443_vm0, %v3440_v9 }
 0x1f9 PF: > { %s13_s14 = sadd.s32 1, %s4617_s14   ;;  %s5193_s12 = smov %s4613_s13 }
 0x1fa   : > { %p10_p5 = scmp.ge.s32.totalorder %s13_s14, 4   ;;  %s5194_s13 = smov %s5196_s15 }
 0x1fc   :  { %12 = sbr.rel (!%p10_p5) target bundleno = 2 (0x2), region = 62 }

</bundles_post_ra>
